<compile_context>
chip_gen: v6e
topology: v6e:2x2x1
jax: 0.10.0
libtpu: 0.0.40
codegen_flags: <defaults>
</compile_context>

<pallas_src>
import functools

import numpy as np
import jax
import jax.numpy as jnp
from jax.experimental import pallas as pl
from jax.experimental.pallas import tpu as pltpu


# --------------------- host-side constant builders --------------------------
def _build_unshuffle_perm(H, W):
    """0/1 matrix P (HW, HW): conv column s=h*W+w  ->  unshuffled column t."""
    HW = H * W
    H2, W2 = H // 2, W // 2
    s = np.arange(HW)
    sh, sw = s // W, s % W
    t = (sh % 2) * (2 * H2 * W2) + (sw % 2) * (H2 * W2) + (sh // 2) * W2 + (sw // 2)
    perm = np.zeros((HW, HW), np.float32)
    perm[s, t] = 1.0
    return perm


def _build_pad_masks(C, H, W):
    """f32 masks (9, C*H*W): validity of each 3x3 tap under zero padding."""
    HW = H * W
    L = C * HW
    lane = np.arange(L)
    pix = lane % HW
    hh, ww = pix // W, pix % W
    masks = np.zeros((9, L), np.float32)
    for kh in range(3):
        for kw in range(3):
            dh, dw = kh - 1, kw - 1
            valid = ((hh + dh >= 0) & (hh + dh < H) &
                     (ww + dw >= 0) & (ww + dw < W))
            masks[kh * 3 + kw] = valid.astype(np.float32)
    return masks


# ------------------------------- kernel --------------------------------------
def _downsample_kernel(x_ref, perm_ref, mask_ref, w_ref, b_ref, o_ref,
                       *, BLK, C, H, W):
    """Fused 3x3 same-conv (stride 1, pad 1) + PixelUnshuffle(2) for BLK rows.

    x_ref:    (BLK, C*H*W)     f32 VMEM   flat NCHW image per row
    perm_ref: (H*W, H*W)       f32 VMEM   resident pixel-unshuffle permutation
    mask_ref: (9, C*H*W)       f32 VMEM   resident zero-padding tap masks
    w_ref:    (Cout*C*9,)      f32 SMEM   flat OIHW conv weight
    b_ref:    (Cout,)          f32 SMEM   conv bias
    o_ref:    (BLK, Cout*H*W)  VMEM       flat (co, i, j, h/2, w/2) per row
    """
    Cout = C // 2
    HW = H * W
    L = C * HW

    x = x_ref[...]                                            # (BLK, L)

    # Accumulators pre-seeded with the bias (bias commutes through the perm).
    accs = [jnp.full((BLK, HW), b_ref[co], jnp.float32) for co in range(Cout)]

    # 3x3 conv on the VPU: each tap = XLU lane-roll of the whole flat image,
    # one f32 vmul against the resident padding mask, then Cin x Cout
    # scalar-broadcast FMAs with weights read from SMEM.
    # TODO(synk): for production C (>=16) replace the ci/co FMA loop with
    # per-tap MXU matmuls in a channels-last tile (keeps VALU off the crit path).
    for kh in range(3):
        for kw in range(3):
            dh, dw = kh - 1, kw - 1
            d = dh * W + dw
            tap = kh * 3 + kw
            xs = pltpu.roll(x, shift=(-d) % L, axis=1) if d != 0 else x
            xs = xs * mask_ref[tap:tap + 1, :]                # 1 vmul / vreg
            for ci in range(C):
                plane = xs[:, ci * HW:(ci + 1) * HW]          # aligned vreg view
                for co in range(Cout):
                    wv = w_ref[(co * C + ci) * 9 + tap]       # SMEM scalar
                    accs[co] = accs[co] + wv * plane

    # PixelUnshuffle(2): one fused MXU matmul for all output channels
    # (perm pushed into MXU weight regs once; lane-dense unmasked stores).
    acc = jnp.concatenate(accs, axis=0)                       # (Cout*BLK, HW)
    y = jnp.dot(acc, perm_ref[...], preferred_element_type=jnp.float32)
    for co in range(Cout):
        o_ref[:, co * HW:(co + 1) * HW] = (
            y[co * BLK:(co + 1) * BLK, :].astype(o_ref.dtype))


# ------------------------------- wrapper --------------------------------------
def downsample_forward(x, w_oihw, bias, *, block_bn=8):
    """Forward of Downsample. x: (B, N, C, H, W); w_oihw: (C//2, C, 3, 3)."""
    B, N, C, H, W = x.shape
    assert H % 2 == 0 and W % 2 == 0 and C % 2 == 0
    BN, Cout, HW = B * N, C // 2, H * W
    L = C * HW

    # Pad flattened batch to a multiple of 8 sublanes (full unmasked vregs).
    BN_pad = ((BN + block_bn - 1) // block_bn) * block_bn
    x2d = x.reshape(BN, L)
    if BN_pad != BN:
        x2d = jnp.pad(x2d, ((0, BN_pad - BN), (0, 0)))

    # Host-built (trace-time) constants; DMA'd once, resident across the grid.
    perm = jnp.asarray(_build_unshuffle_perm(H, W))           # (HW, HW) f32
    masks = jnp.asarray(_build_pad_masks(C, H, W))            # (9, L)   f32
    w_flat = w_oihw.reshape(-1).astype(jnp.float32)
    b_flat = bias.reshape(-1).astype(jnp.float32)

    kernel = functools.partial(_downsample_kernel, BLK=block_bn, C=C, H=H, W=W)
    grid = (BN_pad // block_bn,)

    out2d = pl.pallas_call(
        kernel,
        out_shape=jax.ShapeDtypeStruct((BN_pad, Cout * HW), x.dtype),
        grid=grid,
        in_specs=[
            pl.BlockSpec((block_bn, L), lambda i: (i, 0)),          # x tile
            pl.BlockSpec((HW, HW), lambda i: (0, 0)),               # perm (resident)
            pl.BlockSpec((9, L), lambda i: (0, 0)),                 # masks (resident)
            pl.BlockSpec(memory_space=pltpu.MemorySpace.SMEM),      # conv weight
            pl.BlockSpec(memory_space=pltpu.MemorySpace.SMEM),      # conv bias
        ],
        out_specs=pl.BlockSpec((block_bn, Cout * HW), lambda i: (i, 0)),
        compiler_params=pltpu.CompilerParams(
            dimension_semantics=("parallel",)),
    )(x2d, perm, masks, w_flat, b_flat)

    # Rows are (b n); columns are (co, i, j, h/2, w/2) row-major -> PyTorch
    # PixelUnshuffle channel order, so these are free reshapes/slices.
    out2d = out2d[:BN]
    return out2d.reshape(B, N, 2 * C, H // 2, W // 2)


# ------------------------- pure-JAX reference ------------------------------
def _pixel_unshuffle_ref(x_nchw, r=2):
    Bc, Cc, Hc, Wc = x_nchw.shape
    x = x_nchw.reshape(Bc, Cc, Hc // r, r, Wc // r, r)
    x = jnp.transpose(x, (0, 1, 3, 5, 2, 4))
    return x.reshape(Bc, Cc * r * r, Hc // r, Wc // r)


def _reference_forward(x, w_oihw, bias):
    B, N, C, H, W = x.shape
    xf = x.reshape(B * N, C, H, W)
    y = jax.lax.conv_general_dilated(
        xf, w_oihw, window_strides=(1, 1), padding="SAME",
        dimension_numbers=("NCHW", "OIHW", "NCHW"))
    y = y + bias.reshape(1, -1, 1, 1)
    y = _pixel_unshuffle_ref(y, 2)
    return y.reshape(B, N, 2 * C, H // 2, W // 2)


if __name__ == "__main__":
    # Small shapes consistent with the module: n_feat=4, spatial=16, N=3.
    B, N, C, H, W = 2, 3, 4, 16, 16
    key = jax.random.PRNGKey(0)
    kx, kw, kb = jax.random.split(key, 3)

    x = jax.random.normal(kx, (B, N, C, H, W), dtype=jnp.float32)

    # Deterministic Conv2d(C, C//2, 3, padding=1) params (PyTorch-style init).
    fan_in = C * 3 * 3
    bound = 1.0 / (fan_in ** 0.5)
    w_oihw = jax.random.uniform(kw, (C // 2, C, 3, 3),
                                minval=-bound, maxval=bound, dtype=jnp.float32)
    bias = jax.random.uniform(kb, (C // 2,),
                              minval=-bound, maxval=bound, dtype=jnp.float32)

    out = jax.jit(downsample_forward)(x, w_oihw, bias)
    out = jax.block_until_ready(out)

    ref = _reference_forward(x, w_oihw, bias)
    assert out.shape == (B, N, 2 * C, H // 2, W // 2), out.shape
    assert jnp.allclose(out, ref, rtol=1e-5, atol=1e-5), \
        float(jnp.max(jnp.abs(out - ref)))

    print("KERNEL_OK")
</pallas_src>

<mosaic_0001>
module attributes {stable_mosaic.version = 11 : i64} {
  func.func @_downsample_kernel(%arg0: i32, %arg1: memref<8x1024xf32, #tpu.memory_space<vmem>>, %arg2: memref<256x256xf32, #tpu.memory_space<vmem>>, %arg3: memref<9x1024xf32, #tpu.memory_space<vmem>>, %arg4: memref<72xf32, #tpu.memory_space<smem>>, %arg5: memref<2xf32, #tpu.memory_space<smem>>, %arg6: memref<8x512xf32, #tpu.memory_space<vmem>>) attributes {dimension_semantics = [#tpu.dimension_semantics<parallel>], iteration_bounds = array<i64: 1>, scalar_prefetch = 0 : i64, scratch_operands = 0 : i64, tpu.core_type = #tpu.core_type<tc>, window_params = [{transform_indices = @transform_0, window_bounds = array<i64: 8, 1024>}, {pipeline_mode = #tpu.pipeline_mode<synchronous>, transform_indices = @transform_1, window_bounds = array<i64: 256, 256>}, {pipeline_mode = #tpu.pipeline_mode<synchronous>, transform_indices = @transform_2, window_bounds = array<i64: 9, 1024>}, {transform_indices = @transform_3, window_bounds = array<i64: 72>}, {transform_indices = @transform_4, window_bounds = array<i64: 2>}, {transform_indices = @transform_5, window_bounds = array<i64: 8, 512>}]} {
    %c0 = arith.constant 0 : index
    %c0_0 = arith.constant 0 : index
    %0 = vector.load %arg1[%c0, %c0_0] : memref<8x1024xf32, #tpu.memory_space<vmem>>, vector<8x1024xf32>
    %c0_1 = arith.constant 0 : index
    %1 = memref.load %arg5[%c0_1] : memref<2xf32, #tpu.memory_space<smem>>
    %2 = vector.broadcast %1 : f32 to vector<8x256xf32>
    %c1 = arith.constant 1 : index
    %3 = memref.load %arg5[%c1] : memref<2xf32, #tpu.memory_space<smem>>
    %4 = vector.broadcast %3 : f32 to vector<8x256xf32>
    %c17_i32 = arith.constant 17 : i32
    %5 = tpu.dynamic_rotate %0 by %c17_i32 dim 1 : vector<8x1024xf32>, i32 -> vector<8x1024xf32>
    %c0_2 = arith.constant 0 : index
    %c0_3 = arith.constant 0 : index
    %6 = vector.load %arg3[%c0_2, %c0_3] : memref<9x1024xf32, #tpu.memory_space<vmem>>, vector<1x1024xf32>
    %7 = vector.broadcast %6 : vector<1x1024xf32> to vector<8x1024xf32>
    %8 = arith.mulf %5, %7 : vector<8x1024xf32>
    %9 = vector.extract_strided_slice %8 {offsets = [0, 0], sizes = [8, 256], strides = [1, 1]} : vector<8x1024xf32> to vector<8x256xf32>
    %c0_4 = arith.constant 0 : index
    %10 = memref.load %arg4[%c0_4] : memref<72xf32, #tpu.memory_space<smem>>
    %11 = vector.broadcast %10 : f32 to vector<8x256xf32>
    %12 = arith.mulf %11, %9 : vector<8x256xf32>
    %13 = arith.addf %2, %12 : vector<8x256xf32>
    %c36 = arith.constant 36 : index
    %14 = memref.load %arg4[%c36] : memref<72xf32, #tpu.memory_space<smem>>
    %15 = vector.broadcast %14 : f32 to vector<8x256xf32>
    %16 = arith.mulf %15, %9 : vector<8x256xf32>
    %17 = arith.addf %4, %16 : vector<8x256xf32>
    %18 = vector.extract_strided_slice %8 {offsets = [0, 256], sizes = [8, 256], strides = [1, 1]} : vector<8x1024xf32> to vector<8x256xf32>
    %c9 = arith.constant 9 : index
    %19 = memref.load %arg4[%c9] : memref<72xf32, #tpu.memory_space<smem>>
    %20 = vector.broadcast %19 : f32 to vector<8x256xf32>
    %21 = arith.mulf %20, %18 : vector<8x256xf32>
    %22 = arith.addf %13, %21 : vector<8x256xf32>
    %c45 = arith.constant 45 : index
    %23 = memref.load %arg4[%c45] : memref<72xf32, #tpu.memory_space<smem>>
    %24 = vector.broadcast %23 : f32 to vector<8x256xf32>
    %25 = arith.mulf %24, %18 : vector<8x256xf32>
    %26 = arith.addf %17, %25 : vector<8x256xf32>
    %27 = vector.extract_strided_slice %8 {offsets = [0, 512], sizes = [8, 256], strides = [1, 1]} : vector<8x1024xf32> to vector<8x256xf32>
    %c18 = arith.constant 18 : index
    %28 = memref.load %arg4[%c18] : memref<72xf32, #tpu.memory_space<smem>>
    %29 = vector.broadcast %28 : f32 to vector<8x256xf32>
    %30 = arith.mulf %29, %27 : vector<8x256xf32>
    %31 = arith.addf %22, %30 : vector<8x256xf32>
    %c54 = arith.constant 54 : index
    %32 = memref.load %arg4[%c54] : memref<72xf32, #tpu.memory_space<smem>>
    %33 = vector.broadcast %32 : f32 to vector<8x256xf32>
    %34 = arith.mulf %33, %27 : vector<8x256xf32>
    %35 = arith.addf %26, %34 : vector<8x256xf32>
    %36 = vector.extract_strided_slice %8 {offsets = [0, 768], sizes = [8, 256], strides = [1, 1]} : vector<8x1024xf32> to vector<8x256xf32>
    %c27 = arith.constant 27 : index
    %37 = memref.load %arg4[%c27] : memref<72xf32, #tpu.memory_space<smem>>
    %38 = vector.broadcast %37 : f32 to vector<8x256xf32>
    %39 = arith.mulf %38, %36 : vector<8x256xf32>
    %40 = arith.addf %31, %39 : vector<8x256xf32>
    %c63 = arith.constant 63 : index
    %41 = memref.load %arg4[%c63] : memref<72xf32, #tpu.memory_space<smem>>
    %42 = vector.broadcast %41 : f32 to vector<8x256xf32>
    %43 = arith.mulf %42, %36 : vector<8x256xf32>
    %44 = arith.addf %35, %43 : vector<8x256xf32>
    %c16_i32 = arith.constant 16 : i32
    %45 = tpu.dynamic_rotate %0 by %c16_i32 dim 1 : vector<8x1024xf32>, i32 -> vector<8x1024xf32>
    %c1_5 = arith.constant 1 : index
    %c0_6 = arith.constant 0 : index
    %46 = vector.load %arg3[%c1_5, %c0_6] : memref<9x1024xf32, #tpu.memory_space<vmem>>, vector<1x1024xf32>
    %47 = vector.broadcast %46 : vector<1x1024xf32> to vector<8x1024xf32>
    %48 = arith.mulf %45, %47 : vector<8x1024xf32>
    %49 = vector.extract_strided_slice %48 {offsets = [0, 0], sizes = [8, 256], strides = [1, 1]} : vector<8x1024xf32> to vector<8x256xf32>
    %c1_7 = arith.constant 1 : index
    %50 = memref.load %arg4[%c1_7] : memref<72xf32, #tpu.memory_space<smem>>
    %51 = vector.broadcast %50 : f32 to vector<8x256xf32>
    %52 = arith.mulf %51, %49 : vector<8x256xf32>
    %53 = arith.addf %40, %52 : vector<8x256xf32>
    %c37 = arith.constant 37 : index
    %54 = memref.load %arg4[%c37] : memref<72xf32, #tpu.memory_space<smem>>
    %55 = vector.broadcast %54 : f32 to vector<8x256xf32>
    %56 = arith.mulf %55, %49 : vector<8x256xf32>
    %57 = arith.addf %44, %56 : vector<8x256xf32>
    %58 = vector.extract_strided_slice %48 {offsets = [0, 256], sizes = [8, 256], strides = [1, 1]} : vector<8x1024xf32> to vector<8x256xf32>
    %c10 = arith.constant 10 : index
    %59 = memref.load %arg4[%c10] : memref<72xf32, #tpu.memory_space<smem>>
    %60 = vector.broadcast %59 : f32 to vector<8x256xf32>
    %61 = arith.mulf %60, %58 : vector<8x256xf32>
    %62 = arith.addf %53, %61 : vector<8x256xf32>
    %c46 = arith.constant 46 : index
    %63 = memref.load %arg4[%c46] : memref<72xf32, #tpu.memory_space<smem>>
    %64 = vector.broadcast %63 : f32 to vector<8x256xf32>
    %65 = arith.mulf %64, %58 : vector<8x256xf32>
    %66 = arith.addf %57, %65 : vector<8x256xf32>
    %67 = vector.extract_strided_slice %48 {offsets = [0, 512], sizes = [8, 256], strides = [1, 1]} : vector<8x1024xf32> to vector<8x256xf32>
    %c19 = arith.constant 19 : index
    %68 = memref.load %arg4[%c19] : memref<72xf32, #tpu.memory_space<smem>>
    %69 = vector.broadcast %68 : f32 to vector<8x256xf32>
    %70 = arith.mulf %69, %67 : vector<8x256xf32>
    %71 = arith.addf %62, %70 : vector<8x256xf32>
    %c55 = arith.constant 55 : index
    %72 = memref.load %arg4[%c55] : memref<72xf32, #tpu.memory_space<smem>>
    %73 = vector.broadcast %72 : f32 to vector<8x256xf32>
    %74 = arith.mulf %73, %67 : vector<8x256xf32>
    %75 = arith.addf %66, %74 : vector<8x256xf32>
    %76 = vector.extract_strided_slice %48 {offsets = [0, 768], sizes = [8, 256], strides = [1, 1]} : vector<8x1024xf32> to vector<8x256xf32>
    %c28 = arith.constant 28 : index
    %77 = memref.load %arg4[%c28] : memref<72xf32, #tpu.memory_space<smem>>
    %78 = vector.broadcast %77 : f32 to vector<8x256xf32>
    %79 = arith.mulf %78, %76 : vector<8x256xf32>
    %80 = arith.addf %71, %79 : vector<8x256xf32>
    %c64 = arith.constant 64 : index
    %81 = memref.load %arg4[%c64] : memref<72xf32, #tpu.memory_space<smem>>
    %82 = vector.broadcast %81 : f32 to vector<8x256xf32>
    %83 = arith.mulf %82, %76 : vector<8x256xf32>
    %84 = arith.addf %75, %83 : vector<8x256xf32>
    %c15_i32 = arith.constant 15 : i32
    %85 = tpu.dynamic_rotate %0 by %c15_i32 dim 1 : vector<8x1024xf32>, i32 -> vector<8x1024xf32>
    %c2 = arith.constant 2 : index
    %c0_8 = arith.constant 0 : index
    %86 = vector.load %arg3[%c2, %c0_8] : memref<9x1024xf32, #tpu.memory_space<vmem>>, vector<1x1024xf32>
    %87 = vector.broadcast %86 : vector<1x1024xf32> to vector<8x1024xf32>
    %88 = arith.mulf %85, %87 : vector<8x1024xf32>
    %89 = vector.extract_strided_slice %88 {offsets = [0, 0], sizes = [8, 256], strides = [1, 1]} : vector<8x1024xf32> to vector<8x256xf32>
    %c2_9 = arith.constant 2 : index
    %90 = memref.load %arg4[%c2_9] : memref<72xf32, #tpu.memory_space<smem>>
    %91 = vector.broadcast %90 : f32 to vector<8x256xf32>
    %92 = arith.mulf %91, %89 : vector<8x256xf32>
    %93 = arith.addf %80, %92 : vector<8x256xf32>
    %c38 = arith.constant 38 : index
    %94 = memref.load %arg4[%c38] : memref<72xf32, #tpu.memory_space<smem>>
    %95 = vector.broadcast %94 : f32 to vector<8x256xf32>
    %96 = arith.mulf %95, %89 : vector<8x256xf32>
    %97 = arith.addf %84, %96 : vector<8x256xf32>
    %98 = vector.extract_strided_slice %88 {offsets = [0, 256], sizes = [8, 256], strides = [1, 1]} : vector<8x1024xf32> to vector<8x256xf32>
    %c11 = arith.constant 11 : index
    %99 = memref.load %arg4[%c11] : memref<72xf32, #tpu.memory_space<smem>>
    %100 = vector.broadcast %99 : f32 to vector<8x256xf32>
    %101 = arith.mulf %100, %98 : vector<8x256xf32>
    %102 = arith.addf %93, %101 : vector<8x256xf32>
    %c47 = arith.constant 47 : index
    %103 = memref.load %arg4[%c47] : memref<72xf32, #tpu.memory_space<smem>>
    %104 = vector.broadcast %103 : f32 to vector<8x256xf32>
    %105 = arith.mulf %104, %98 : vector<8x256xf32>
    %106 = arith.addf %97, %105 : vector<8x256xf32>
    %107 = vector.extract_strided_slice %88 {offsets = [0, 512], sizes = [8, 256], strides = [1, 1]} : vector<8x1024xf32> to vector<8x256xf32>
    %c20 = arith.constant 20 : index
    %108 = memref.load %arg4[%c20] : memref<72xf32, #tpu.memory_space<smem>>
    %109 = vector.broadcast %108 : f32 to vector<8x256xf32>
    %110 = arith.mulf %109, %107 : vector<8x256xf32>
    %111 = arith.addf %102, %110 : vector<8x256xf32>
    %c56 = arith.constant 56 : index
    %112 = memref.load %arg4[%c56] : memref<72xf32, #tpu.memory_space<smem>>
    %113 = vector.broadcast %112 : f32 to vector<8x256xf32>
    %114 = arith.mulf %113, %107 : vector<8x256xf32>
    %115 = arith.addf %106, %114 : vector<8x256xf32>
    %116 = vector.extract_strided_slice %88 {offsets = [0, 768], sizes = [8, 256], strides = [1, 1]} : vector<8x1024xf32> to vector<8x256xf32>
    %c29 = arith.constant 29 : index
    %117 = memref.load %arg4[%c29] : memref<72xf32, #tpu.memory_space<smem>>
    %118 = vector.broadcast %117 : f32 to vector<8x256xf32>
    %119 = arith.mulf %118, %116 : vector<8x256xf32>
    %120 = arith.addf %111, %119 : vector<8x256xf32>
    %c65 = arith.constant 65 : index
    %121 = memref.load %arg4[%c65] : memref<72xf32, #tpu.memory_space<smem>>
    %122 = vector.broadcast %121 : f32 to vector<8x256xf32>
    %123 = arith.mulf %122, %116 : vector<8x256xf32>
    %124 = arith.addf %115, %123 : vector<8x256xf32>
    %c1_i32 = arith.constant 1 : i32
    %125 = tpu.dynamic_rotate %0 by %c1_i32 dim 1 : vector<8x1024xf32>, i32 -> vector<8x1024xf32>
    %c3 = arith.constant 3 : index
    %c0_10 = arith.constant 0 : index
    %126 = vector.load %arg3[%c3, %c0_10] : memref<9x1024xf32, #tpu.memory_space<vmem>>, vector<1x1024xf32>
    %127 = vector.broadcast %126 : vector<1x1024xf32> to vector<8x1024xf32>
    %128 = arith.mulf %125, %127 : vector<8x1024xf32>
    %129 = vector.extract_strided_slice %128 {offsets = [0, 0], sizes = [8, 256], strides = [1, 1]} : vector<8x1024xf32> to vector<8x256xf32>
    %c3_11 = arith.constant 3 : index
    %130 = memref.load %arg4[%c3_11] : memref<72xf32, #tpu.memory_space<smem>>
    %131 = vector.broadcast %130 : f32 to vector<8x256xf32>
    %132 = arith.mulf %131, %129 : vector<8x256xf32>
    %133 = arith.addf %120, %132 : vector<8x256xf32>
    %c39 = arith.constant 39 : index
    %134 = memref.load %arg4[%c39] : memref<72xf32, #tpu.memory_space<smem>>
    %135 = vector.broadcast %134 : f32 to vector<8x256xf32>
    %136 = arith.mulf %135, %129 : vector<8x256xf32>
    %137 = arith.addf %124, %136 : vector<8x256xf32>
    %138 = vector.extract_strided_slice %128 {offsets = [0, 256], sizes = [8, 256], strides = [1, 1]} : vector<8x1024xf32> to vector<8x256xf32>
    %c12 = arith.constant 12 : index
    %139 = memref.load %arg4[%c12] : memref<72xf32, #tpu.memory_space<smem>>
    %140 = vector.broadcast %139 : f32 to vector<8x256xf32>
    %141 = arith.mulf %140, %138 : vector<8x256xf32>
    %142 = arith.addf %133, %141 : vector<8x256xf32>
    %c48 = arith.constant 48 : index
    %143 = memref.load %arg4[%c48] : memref<72xf32, #tpu.memory_space<smem>>
    %144 = vector.broadcast %143 : f32 to vector<8x256xf32>
    %145 = arith.mulf %144, %138 : vector<8x256xf32>
    %146 = arith.addf %137, %145 : vector<8x256xf32>
    %147 = vector.extract_strided_slice %128 {offsets = [0, 512], sizes = [8, 256], strides = [1, 1]} : vector<8x1024xf32> to vector<8x256xf32>
    %c21 = arith.constant 21 : index
    %148 = memref.load %arg4[%c21] : memref<72xf32, #tpu.memory_space<smem>>
    %149 = vector.broadcast %148 : f32 to vector<8x256xf32>
    %150 = arith.mulf %149, %147 : vector<8x256xf32>
    %151 = arith.addf %142, %150 : vector<8x256xf32>
    %c57 = arith.constant 57 : index
    %152 = memref.load %arg4[%c57] : memref<72xf32, #tpu.memory_space<smem>>
    %153 = vector.broadcast %152 : f32 to vector<8x256xf32>
    %154 = arith.mulf %153, %147 : vector<8x256xf32>
    %155 = arith.addf %146, %154 : vector<8x256xf32>
    %156 = vector.extract_strided_slice %128 {offsets = [0, 768], sizes = [8, 256], strides = [1, 1]} : vector<8x1024xf32> to vector<8x256xf32>
    %c30 = arith.constant 30 : index
    %157 = memref.load %arg4[%c30] : memref<72xf32, #tpu.memory_space<smem>>
    %158 = vector.broadcast %157 : f32 to vector<8x256xf32>
    %159 = arith.mulf %158, %156 : vector<8x256xf32>
    %160 = arith.addf %151, %159 : vector<8x256xf32>
    %c66 = arith.constant 66 : index
    %161 = memref.load %arg4[%c66] : memref<72xf32, #tpu.memory_space<smem>>
    %162 = vector.broadcast %161 : f32 to vector<8x256xf32>
    %163 = arith.mulf %162, %156 : vector<8x256xf32>
    %164 = arith.addf %155, %163 : vector<8x256xf32>
    %c4 = arith.constant 4 : index
    %c0_12 = arith.constant 0 : index
    %165 = vector.load %arg3[%c4, %c0_12] : memref<9x1024xf32, #tpu.memory_space<vmem>>, vector<1x1024xf32>
    %166 = vector.broadcast %165 : vector<1x1024xf32> to vector<8x1024xf32>
    %167 = arith.mulf %0, %166 : vector<8x1024xf32>
    %168 = vector.extract_strided_slice %167 {offsets = [0, 0], sizes = [8, 256], strides = [1, 1]} : vector<8x1024xf32> to vector<8x256xf32>
    %c4_13 = arith.constant 4 : index
    %169 = memref.load %arg4[%c4_13] : memref<72xf32, #tpu.memory_space<smem>>
    %170 = vector.broadcast %169 : f32 to vector<8x256xf32>
    %171 = arith.mulf %170, %168 : vector<8x256xf32>
    %172 = arith.addf %160, %171 : vector<8x256xf32>
    %c40 = arith.constant 40 : index
    %173 = memref.load %arg4[%c40] : memref<72xf32, #tpu.memory_space<smem>>
    %174 = vector.broadcast %173 : f32 to vector<8x256xf32>
    %175 = arith.mulf %174, %168 : vector<8x256xf32>
    %176 = arith.addf %164, %175 : vector<8x256xf32>
    %177 = vector.extract_strided_slice %167 {offsets = [0, 256], sizes = [8, 256], strides = [1, 1]} : vector<8x1024xf32> to vector<8x256xf32>
    %c13 = arith.constant 13 : index
    %178 = memref.load %arg4[%c13] : memref<72xf32, #tpu.memory_space<smem>>
    %179 = vector.broadcast %178 : f32 to vector<8x256xf32>
    %180 = arith.mulf %179, %177 : vector<8x256xf32>
    %181 = arith.addf %172, %180 : vector<8x256xf32>
    %c49 = arith.constant 49 : index
    %182 = memref.load %arg4[%c49] : memref<72xf32, #tpu.memory_space<smem>>
    %183 = vector.broadcast %182 : f32 to vector<8x256xf32>
    %184 = arith.mulf %183, %177 : vector<8x256xf32>
    %185 = arith.addf %176, %184 : vector<8x256xf32>
    %186 = vector.extract_strided_slice %167 {offsets = [0, 512], sizes = [8, 256], strides = [1, 1]} : vector<8x1024xf32> to vector<8x256xf32>
    %c22 = arith.constant 22 : index
    %187 = memref.load %arg4[%c22] : memref<72xf32, #tpu.memory_space<smem>>
    %188 = vector.broadcast %187 : f32 to vector<8x256xf32>
    %189 = arith.mulf %188, %186 : vector<8x256xf32>
    %190 = arith.addf %181, %189 : vector<8x256xf32>
    %c58 = arith.constant 58 : index
    %191 = memref.load %arg4[%c58] : memref<72xf32, #tpu.memory_space<smem>>
    %192 = vector.broadcast %191 : f32 to vector<8x256xf32>
    %193 = arith.mulf %192, %186 : vector<8x256xf32>
    %194 = arith.addf %185, %193 : vector<8x256xf32>
    %195 = vector.extract_strided_slice %167 {offsets = [0, 768], sizes = [8, 256], strides = [1, 1]} : vector<8x1024xf32> to vector<8x256xf32>
    %c31 = arith.constant 31 : index
    %196 = memref.load %arg4[%c31] : memref<72xf32, #tpu.memory_space<smem>>
    %197 = vector.broadcast %196 : f32 to vector<8x256xf32>
    %198 = arith.mulf %197, %195 : vector<8x256xf32>
    %199 = arith.addf %190, %198 : vector<8x256xf32>
    %c67 = arith.constant 67 : index
    %200 = memref.load %arg4[%c67] : memref<72xf32, #tpu.memory_space<smem>>
    %201 = vector.broadcast %200 : f32 to vector<8x256xf32>
    %202 = arith.mulf %201, %195 : vector<8x256xf32>
    %203 = arith.addf %194, %202 : vector<8x256xf32>
    %c1023_i32 = arith.constant 1023 : i32
    %204 = tpu.dynamic_rotate %0 by %c1023_i32 dim 1 : vector<8x1024xf32>, i32 -> vector<8x1024xf32>
    %c5 = arith.constant 5 : index
    %c0_14 = arith.constant 0 : index
    %205 = vector.load %arg3[%c5, %c0_14] : memref<9x1024xf32, #tpu.memory_space<vmem>>, vector<1x1024xf32>
    %206 = vector.broadcast %205 : vector<1x1024xf32> to vector<8x1024xf32>
    %207 = arith.mulf %204, %206 : vector<8x1024xf32>
    %208 = vector.extract_strided_slice %207 {offsets = [0, 0], sizes = [8, 256], strides = [1, 1]} : vector<8x1024xf32> to vector<8x256xf32>
    %c5_15 = arith.constant 5 : index
    %209 = memref.load %arg4[%c5_15] : memref<72xf32, #tpu.memory_space<smem>>
    %210 = vector.broadcast %209 : f32 to vector<8x256xf32>
    %211 = arith.mulf %210, %208 : vector<8x256xf32>
    %212 = arith.addf %199, %211 : vector<8x256xf32>
    %c41 = arith.constant 41 : index
    %213 = memref.load %arg4[%c41] : memref<72xf32, #tpu.memory_space<smem>>
    %214 = vector.broadcast %213 : f32 to vector<8x256xf32>
    %215 = arith.mulf %214, %208 : vector<8x256xf32>
    %216 = arith.addf %203, %215 : vector<8x256xf32>
    %217 = vector.extract_strided_slice %207 {offsets = [0, 256], sizes = [8, 256], strides = [1, 1]} : vector<8x1024xf32> to vector<8x256xf32>
    %c14 = arith.constant 14 : index
    %218 = memref.load %arg4[%c14] : memref<72xf32, #tpu.memory_space<smem>>
    %219 = vector.broadcast %218 : f32 to vector<8x256xf32>
    %220 = arith.mulf %219, %217 : vector<8x256xf32>
    %221 = arith.addf %212, %220 : vector<8x256xf32>
    %c50 = arith.constant 50 : index
    %222 = memref.load %arg4[%c50] : memref<72xf32, #tpu.memory_space<smem>>
    %223 = vector.broadcast %222 : f32 to vector<8x256xf32>
    %224 = arith.mulf %223, %217 : vector<8x256xf32>
    %225 = arith.addf %216, %224 : vector<8x256xf32>
    %226 = vector.extract_strided_slice %207 {offsets = [0, 512], sizes = [8, 256], strides = [1, 1]} : vector<8x1024xf32> to vector<8x256xf32>
    %c23 = arith.constant 23 : index
    %227 = memref.load %arg4[%c23] : memref<72xf32, #tpu.memory_space<smem>>
    %228 = vector.broadcast %227 : f32 to vector<8x256xf32>
    %229 = arith.mulf %228, %226 : vector<8x256xf32>
    %230 = arith.addf %221, %229 : vector<8x256xf32>
    %c59 = arith.constant 59 : index
    %231 = memref.load %arg4[%c59] : memref<72xf32, #tpu.memory_space<smem>>
    %232 = vector.broadcast %231 : f32 to vector<8x256xf32>
    %233 = arith.mulf %232, %226 : vector<8x256xf32>
    %234 = arith.addf %225, %233 : vector<8x256xf32>
    %235 = vector.extract_strided_slice %207 {offsets = [0, 768], sizes = [8, 256], strides = [1, 1]} : vector<8x1024xf32> to vector<8x256xf32>
    %c32 = arith.constant 32 : index
    %236 = memref.load %arg4[%c32] : memref<72xf32, #tpu.memory_space<smem>>
    %237 = vector.broadcast %236 : f32 to vector<8x256xf32>
    %238 = arith.mulf %237, %235 : vector<8x256xf32>
    %239 = arith.addf %230, %238 : vector<8x256xf32>
    %c68 = arith.constant 68 : index
    %240 = memref.load %arg4[%c68] : memref<72xf32, #tpu.memory_space<smem>>
    %241 = vector.broadcast %240 : f32 to vector<8x256xf32>
    %242 = arith.mulf %241, %235 : vector<8x256xf32>
    %243 = arith.addf %234, %242 : vector<8x256xf32>
    %c1009_i32 = arith.constant 1009 : i32
    %244 = tpu.dynamic_rotate %0 by %c1009_i32 dim 1 : vector<8x1024xf32>, i32 -> vector<8x1024xf32>
    %c6 = arith.constant 6 : index
    %c0_16 = arith.constant 0 : index
    %245 = vector.load %arg3[%c6, %c0_16] : memref<9x1024xf32, #tpu.memory_space<vmem>>, vector<1x1024xf32>
    %246 = vector.broadcast %245 : vector<1x1024xf32> to vector<8x1024xf32>
    %247 = arith.mulf %244, %246 : vector<8x1024xf32>
    %248 = vector.extract_strided_slice %247 {offsets = [0, 0], sizes = [8, 256], strides = [1, 1]} : vector<8x1024xf32> to vector<8x256xf32>
    %c6_17 = arith.constant 6 : index
    %249 = memref.load %arg4[%c6_17] : memref<72xf32, #tpu.memory_space<smem>>
    %250 = vector.broadcast %249 : f32 to vector<8x256xf32>
    %251 = arith.mulf %250, %248 : vector<8x256xf32>
    %252 = arith.addf %239, %251 : vector<8x256xf32>
    %c42 = arith.constant 42 : index
    %253 = memref.load %arg4[%c42] : memref<72xf32, #tpu.memory_space<smem>>
    %254 = vector.broadcast %253 : f32 to vector<8x256xf32>
    %255 = arith.mulf %254, %248 : vector<8x256xf32>
    %256 = arith.addf %243, %255 : vector<8x256xf32>
    %257 = vector.extract_strided_slice %247 {offsets = [0, 256], sizes = [8, 256], strides = [1, 1]} : vector<8x1024xf32> to vector<8x256xf32>
    %c15 = arith.constant 15 : index
    %258 = memref.load %arg4[%c15] : memref<72xf32, #tpu.memory_space<smem>>
    %259 = vector.broadcast %258 : f32 to vector<8x256xf32>
    %260 = arith.mulf %259, %257 : vector<8x256xf32>
    %261 = arith.addf %252, %260 : vector<8x256xf32>
    %c51 = arith.constant 51 : index
    %262 = memref.load %arg4[%c51] : memref<72xf32, #tpu.memory_space<smem>>
    %263 = vector.broadcast %262 : f32 to vector<8x256xf32>
    %264 = arith.mulf %263, %257 : vector<8x256xf32>
    %265 = arith.addf %256, %264 : vector<8x256xf32>
    %266 = vector.extract_strided_slice %247 {offsets = [0, 512], sizes = [8, 256], strides = [1, 1]} : vector<8x1024xf32> to vector<8x256xf32>
    %c24 = arith.constant 24 : index
    %267 = memref.load %arg4[%c24] : memref<72xf32, #tpu.memory_space<smem>>
    %268 = vector.broadcast %267 : f32 to vector<8x256xf32>
    %269 = arith.mulf %268, %266 : vector<8x256xf32>
    %270 = arith.addf %261, %269 : vector<8x256xf32>
    %c60 = arith.constant 60 : index
    %271 = memref.load %arg4[%c60] : memref<72xf32, #tpu.memory_space<smem>>
    %272 = vector.broadcast %271 : f32 to vector<8x256xf32>
    %273 = arith.mulf %272, %266 : vector<8x256xf32>
    %274 = arith.addf %265, %273 : vector<8x256xf32>
    %275 = vector.extract_strided_slice %247 {offsets = [0, 768], sizes = [8, 256], strides = [1, 1]} : vector<8x1024xf32> to vector<8x256xf32>
    %c33 = arith.constant 33 : index
    %276 = memref.load %arg4[%c33] : memref<72xf32, #tpu.memory_space<smem>>
    %277 = vector.broadcast %276 : f32 to vector<8x256xf32>
    %278 = arith.mulf %277, %275 : vector<8x256xf32>
    %279 = arith.addf %270, %278 : vector<8x256xf32>
    %c69 = arith.constant 69 : index
    %280 = memref.load %arg4[%c69] : memref<72xf32, #tpu.memory_space<smem>>
    %281 = vector.broadcast %280 : f32 to vector<8x256xf32>
    %282 = arith.mulf %281, %275 : vector<8x256xf32>
    %283 = arith.addf %274, %282 : vector<8x256xf32>
    %c1008_i32 = arith.constant 1008 : i32
    %284 = tpu.dynamic_rotate %0 by %c1008_i32 dim 1 : vector<8x1024xf32>, i32 -> vector<8x1024xf32>
    %c7 = arith.constant 7 : index
    %c0_18 = arith.constant 0 : index
    %285 = vector.load %arg3[%c7, %c0_18] : memref<9x1024xf32, #tpu.memory_space<vmem>>, vector<1x1024xf32>
    %286 = vector.broadcast %285 : vector<1x1024xf32> to vector<8x1024xf32>
    %287 = arith.mulf %284, %286 : vector<8x1024xf32>
    %288 = vector.extract_strided_slice %287 {offsets = [0, 0], sizes = [8, 256], strides = [1, 1]} : vector<8x1024xf32> to vector<8x256xf32>
    %c7_19 = arith.constant 7 : index
    %289 = memref.load %arg4[%c7_19] : memref<72xf32, #tpu.memory_space<smem>>
    %290 = vector.broadcast %289 : f32 to vector<8x256xf32>
    %291 = arith.mulf %290, %288 : vector<8x256xf32>
    %292 = arith.addf %279, %291 : vector<8x256xf32>
    %c43 = arith.constant 43 : index
    %293 = memref.load %arg4[%c43] : memref<72xf32, #tpu.memory_space<smem>>
    %294 = vector.broadcast %293 : f32 to vector<8x256xf32>
    %295 = arith.mulf %294, %288 : vector<8x256xf32>
    %296 = arith.addf %283, %295 : vector<8x256xf32>
    %297 = vector.extract_strided_slice %287 {offsets = [0, 256], sizes = [8, 256], strides = [1, 1]} : vector<8x1024xf32> to vector<8x256xf32>
    %c16 = arith.constant 16 : index
    %298 = memref.load %arg4[%c16] : memref<72xf32, #tpu.memory_space<smem>>
    %299 = vector.broadcast %298 : f32 to vector<8x256xf32>
    %300 = arith.mulf %299, %297 : vector<8x256xf32>
    %301 = arith.addf %292, %300 : vector<8x256xf32>
    %c52 = arith.constant 52 : index
    %302 = memref.load %arg4[%c52] : memref<72xf32, #tpu.memory_space<smem>>
    %303 = vector.broadcast %302 : f32 to vector<8x256xf32>
    %304 = arith.mulf %303, %297 : vector<8x256xf32>
    %305 = arith.addf %296, %304 : vector<8x256xf32>
    %306 = vector.extract_strided_slice %287 {offsets = [0, 512], sizes = [8, 256], strides = [1, 1]} : vector<8x1024xf32> to vector<8x256xf32>
    %c25 = arith.constant 25 : index
    %307 = memref.load %arg4[%c25] : memref<72xf32, #tpu.memory_space<smem>>
    %308 = vector.broadcast %307 : f32 to vector<8x256xf32>
    %309 = arith.mulf %308, %306 : vector<8x256xf32>
    %310 = arith.addf %301, %309 : vector<8x256xf32>
    %c61 = arith.constant 61 : index
    %311 = memref.load %arg4[%c61] : memref<72xf32, #tpu.memory_space<smem>>
    %312 = vector.broadcast %311 : f32 to vector<8x256xf32>
    %313 = arith.mulf %312, %306 : vector<8x256xf32>
    %314 = arith.addf %305, %313 : vector<8x256xf32>
    %315 = vector.extract_strided_slice %287 {offsets = [0, 768], sizes = [8, 256], strides = [1, 1]} : vector<8x1024xf32> to vector<8x256xf32>
    %c34 = arith.constant 34 : index
    %316 = memref.load %arg4[%c34] : memref<72xf32, #tpu.memory_space<smem>>
    %317 = vector.broadcast %316 : f32 to vector<8x256xf32>
    %318 = arith.mulf %317, %315 : vector<8x256xf32>
    %319 = arith.addf %310, %318 : vector<8x256xf32>
    %c70 = arith.constant 70 : index
    %320 = memref.load %arg4[%c70] : memref<72xf32, #tpu.memory_space<smem>>
    %321 = vector.broadcast %320 : f32 to vector<8x256xf32>
    %322 = arith.mulf %321, %315 : vector<8x256xf32>
    %323 = arith.addf %314, %322 : vector<8x256xf32>
    %c1007_i32 = arith.constant 1007 : i32
    %324 = tpu.dynamic_rotate %0 by %c1007_i32 dim 1 : vector<8x1024xf32>, i32 -> vector<8x1024xf32>
    %c8 = arith.constant 8 : index
    %c0_20 = arith.constant 0 : index
    %325 = vector.load %arg3[%c8, %c0_20] : memref<9x1024xf32, #tpu.memory_space<vmem>>, vector<1x1024xf32>
    %326 = vector.broadcast %325 : vector<1x1024xf32> to vector<8x1024xf32>
    %327 = arith.mulf %324, %326 : vector<8x1024xf32>
    %328 = vector.extract_strided_slice %327 {offsets = [0, 0], sizes = [8, 256], strides = [1, 1]} : vector<8x1024xf32> to vector<8x256xf32>
    %c8_21 = arith.constant 8 : index
    %329 = memref.load %arg4[%c8_21] : memref<72xf32, #tpu.memory_space<smem>>
    %330 = vector.broadcast %329 : f32 to vector<8x256xf32>
    %331 = arith.mulf %330, %328 : vector<8x256xf32>
    %332 = arith.addf %319, %331 : vector<8x256xf32>
    %c44 = arith.constant 44 : index
    %333 = memref.load %arg4[%c44] : memref<72xf32, #tpu.memory_space<smem>>
    %334 = vector.broadcast %333 : f32 to vector<8x256xf32>
    %335 = arith.mulf %334, %328 : vector<8x256xf32>
    %336 = arith.addf %323, %335 : vector<8x256xf32>
    %337 = vector.extract_strided_slice %327 {offsets = [0, 256], sizes = [8, 256], strides = [1, 1]} : vector<8x1024xf32> to vector<8x256xf32>
    %c17 = arith.constant 17 : index
    %338 = memref.load %arg4[%c17] : memref<72xf32, #tpu.memory_space<smem>>
    %339 = vector.broadcast %338 : f32 to vector<8x256xf32>
    %340 = arith.mulf %339, %337 : vector<8x256xf32>
    %341 = arith.addf %332, %340 : vector<8x256xf32>
    %c53 = arith.constant 53 : index
    %342 = memref.load %arg4[%c53] : memref<72xf32, #tpu.memory_space<smem>>
    %343 = vector.broadcast %342 : f32 to vector<8x256xf32>
    %344 = arith.mulf %343, %337 : vector<8x256xf32>
    %345 = arith.addf %336, %344 : vector<8x256xf32>
    %346 = vector.extract_strided_slice %327 {offsets = [0, 512], sizes = [8, 256], strides = [1, 1]} : vector<8x1024xf32> to vector<8x256xf32>
    %c26 = arith.constant 26 : index
    %347 = memref.load %arg4[%c26] : memref<72xf32, #tpu.memory_space<smem>>
    %348 = vector.broadcast %347 : f32 to vector<8x256xf32>
    %349 = arith.mulf %348, %346 : vector<8x256xf32>
    %350 = arith.addf %341, %349 : vector<8x256xf32>
    %c62 = arith.constant 62 : index
    %351 = memref.load %arg4[%c62] : memref<72xf32, #tpu.memory_space<smem>>
    %352 = vector.broadcast %351 : f32 to vector<8x256xf32>
    %353 = arith.mulf %352, %346 : vector<8x256xf32>
    %354 = arith.addf %345, %353 : vector<8x256xf32>
    %355 = vector.extract_strided_slice %327 {offsets = [0, 768], sizes = [8, 256], strides = [1, 1]} : vector<8x1024xf32> to vector<8x256xf32>
    %c35 = arith.constant 35 : index
    %356 = memref.load %arg4[%c35] : memref<72xf32, #tpu.memory_space<smem>>
    %357 = vector.broadcast %356 : f32 to vector<8x256xf32>
    %358 = arith.mulf %357, %355 : vector<8x256xf32>
    %359 = arith.addf %350, %358 : vector<8x256xf32>
    %c71 = arith.constant 71 : index
    %360 = memref.load %arg4[%c71] : memref<72xf32, #tpu.memory_space<smem>>
    %361 = vector.broadcast %360 : f32 to vector<8x256xf32>
    %362 = arith.mulf %361, %355 : vector<8x256xf32>
    %363 = arith.addf %354, %362 : vector<8x256xf32>
    %364 = tpu.concatenate %359, %363 in 0 : vector<8x256xf32>, vector<8x256xf32> -> vector<16x256xf32>
    %c0_22 = arith.constant 0 : index
    %c0_23 = arith.constant 0 : index
    %365 = vector.load %arg2[%c0_22, %c0_23] : memref<256x256xf32, #tpu.memory_space<vmem>>, vector<256x256xf32>
    %cst = arith.constant dense<0.000000e+00> : vector<16x256xf32>
    %366 = tpu.matmul %364, %365, %cst {dimension_numbers = #tpu.dot_dimension_numbers<[1], [0], [0], [1], [0, 0, 1, 1], [], []>} : vector<16x256xf32>, vector<256x256xf32>, vector<16x256xf32> -> vector<16x256xf32>
    %367 = vector.extract_strided_slice %366 {offsets = [0, 0], sizes = [8, 256], strides = [1, 1]} : vector<16x256xf32> to vector<8x256xf32>
    %c0_24 = arith.constant 0 : index
    %c0_25 = arith.constant 0 : index
    %368 = vector.load %arg6[%c0_24, %c0_25] : memref<8x512xf32, #tpu.memory_space<vmem>>, vector<8x256xf32>
    tpu.vector_store %arg6[%c0_24, %c0_25], %367 {strides = array<i32>} : memref<8x512xf32, #tpu.memory_space<vmem>>, vector<8x256xf32>,
    %369 = vector.extract_strided_slice %366 {offsets = [8, 0], sizes = [8, 256], strides = [1, 1]} : vector<16x256xf32> to vector<8x256xf32>
    %c0_26 = arith.constant 0 : index
    %c256 = arith.constant 256 : index
    %370 = vector.load %arg6[%c0_26, %c256] : memref<8x512xf32, #tpu.memory_space<vmem>>, vector<8x256xf32>
    tpu.vector_store %arg6[%c0_26, %c256], %369 {strides = array<i32>} : memref<8x512xf32, #tpu.memory_space<vmem>>, vector<8x256xf32>,
    return
  }
  func.func @transform_0(%arg0: i32) -> (i32, i32) {
    %c0_i32 = arith.constant 0 : i32
    %c0_i32_0 = arith.constant 0 : i32
    return %arg0, %c0_i32 : i32, i32
  }
  func.func @transform_1(%arg0: i32) -> (i32, i32) {
    %c0_i32 = arith.constant 0 : i32
    %c0_i32_0 = arith.constant 0 : i32
    %c0_i32_1 = arith.constant 0 : i32
    return %c0_i32, %c0_i32_0 : i32, i32
  }
  func.func @transform_2(%arg0: i32) -> (i32, i32) {
    %c0_i32 = arith.constant 0 : i32
    %c0_i32_0 = arith.constant 0 : i32
    %c0_i32_1 = arith.constant 0 : i32
    return %c0_i32, %c0_i32_0 : i32, i32
  }
  func.func @transform_3(%arg0: i32) -> i32 {
    %c0_i32 = arith.constant 0 : i32
    %c0_i32_0 = arith.constant 0 : i32
    return %c0_i32 : i32
  }
  func.func @transform_4(%arg0: i32) -> i32 {
    %c0_i32 = arith.constant 0 : i32
    %c0_i32_0 = arith.constant 0 : i32
    return %c0_i32 : i32
  }
  func.func @transform_5(%arg0: i32) -> (i32, i32) {
    %c0_i32 = arith.constant 0 : i32
    %c0_i32_0 = arith.constant 0 : i32
    return %arg0, %c0_i32 : i32, i32
  }
}

</mosaic_0001>

<bundles_post_ra>
// kernel: downsample_forward.1
= control target key start
LH: loop header
LB: loop body
LE: loop exit
PB: predicated region body
PF: predicated region fallthrough
CT: control target
= control target key end

     0   :  { %s3013_s0 = inlined_call_operand.vmem [shape: f32[8,1024], index: 0, kind: input, shape index: {}]   ;;  %s3014_s1 = inlined_call_operand.vmem [shape: f32[256,256], index: 1, kind: input, shape index: {}]   ;;  %s3015_s2 = inlined_call_operand.vmem [shape: f32[9,1024], index: 2, kind: input, shape index: {}]   ;;  %s3016_s3 = inlined_call_operand.vmem [shape: f32[72], index: 3, kind: input, shape index: {}]   ;;  %s3017_s4 = inlined_call_operand.vmem [shape: f32[2], index: 4, kind: input, shape index: {}]   ;;  %s3018_s5 = inlined_call_operand.vmem [shape: f32[8,512], index: 5, kind: output, shape index: {}]  }
   0x1   :  { %3046 = sst [smem:[#allocation18_spill]] %s3015_s2 }
   0x2   :  { %3047 = sst [smem:[#allocation19_spill]] %s3018_s5 }
   0x3   :  { %10 = vsyncpa [#allocation3], 0  ;;  %s24_s20 = sshll.u32 %s3016_s3, 4  ;;  %s25_s20 = int_to_ptr.vmem [resolvable:$true] %s24_s20 }
   0x4   :  { %11 = vsyncpa [#allocation5], 0  ;;  %s34_s23 = sshll.u32 %s3017_s4, 4  ;;  %s1480_s24 = scalar_lea.vmem %s25_s20, 16  ;;  %s35_s23 = int_to_ptr.vmem [resolvable:$true] %s34_s23 }
   0x5   :  { %p1481_p0 = scmp.ne.s32.totalorder %s25_s20, %s1480_s24  ;;  %p1485_p1 = scmp.lt.s32.totalorder %s25_s20, %s25_s20 }
   0x6   :  { %p1486_p2 = scmp.lt.s32.totalorder %s1480_s24, %s1480_s24 }
   0x8   :  { %p1487_p3 = por %p1486_p2, %p1485_p1 }
   0xa   :  { %p1488_p4 = pnand %p1487_p3, %p1481_p0 }
   0xc   :  { %1491 = shalt.err (!%p1488_p4)
}
   0xd   :  { %s1508_s25 = smov [#allocation2]   ;;  %s1492_s26 = scalar_lea.vmem %s35_s23, 16 }
   0xe   :  { %27 = dma.vmem_to_smem %s25_s20, 16, %s1508_s25, [#allocation3]  }
   0xf   :  { %p1493_p5 = scmp.ne.s32.totalorder %s35_s23, %s1492_s26  ;;  %p1497_p6 = scmp.lt.s32.totalorder %s35_s23, %s35_s23 }
  0x10   :  { %p1498_p7 = scmp.lt.s32.totalorder %s1492_s26, %s1492_s26 }
  0x12   :  { %p1499_p8 = por %p1498_p7, %p1497_p6 }
  0x14   :  { %p1500_p9 = pnand %p1499_p8, %p1493_p5 }
  0x16   :  { %1503 = shalt.err (!%p1500_p9)
}
  0x17   :  { %s1509_s3 = smov [#allocation4]  }
  0x18   :  { %37 = dma.vmem_to_smem %s35_s23, 16, %s1509_s3, [#allocation5]  }
  0x19   :  { %1504 = dma.done.wait [#allocation3], 16  }
  0x1a   :  { %1505 = vsyncadd [#allocation3], 4294967280 }
  0x1b   :  { %1506 = dma.done.wait [#allocation5], 16  }
  0x1c   :  { %1507 = vsyncadd [#allocation5], 4294967280 }
  0x1d   :  { %44 = sfence }
  0x1e   :  { %v1557_v0 = vld [vmem:[%s3013_s0 + $0x38] sm:$0xff]  ;;  %v1562_v1 = vld [vmem:[%s3013_s0] sm:$0xff]  ;;  %s1510_s30 = smov 17   ;;  %v1569_v2 = vld [vmem:[%s3013_s0 + $0x10] sm:$0xff]  ;;  %s1511_s18 = smov 16   ;;  %v73_v31 = vlaneseq }
  0x1f   :  { %71 = vrot.lane.b32.xlu1 %v1557_v0, %s1510_s30  ;;  %57 = vrot.lane.b32.xlu0 %v1562_v1, %s1510_s30  ;;  %v1574_v3 = vld [vmem:[%s3013_s0 + $0x8] sm:$0xff]  ;;  %v1581_v4 = vld [vmem:[%s3013_s0 + $0x20] sm:$0xff]  ;;  %s1513_s19 = smov 1   ;;  %s1514_s4 = smov 127  }
  0x20   :  { %v1586_v5 = vld [vmem:[%s3013_s0 + $0x18] sm:$0xff]  ;;  %v1593_v6 = vld [vmem:[%s3013_s0 + $0x30] sm:$0xff]  ;;  %v1598_v7 = vld [vmem:[%s3013_s0 + $0x28] sm:$0xff]  ;;  %s1512_s0 = smov 15   ;;  %s1515_s3 = smov 113   ;;  %v89_v35 = vshrl.u32 %v73_v31, 7 }
  0x21   :  { %v1198_v8 = vld [vmem:[%s3014_s1 + $0xf8] sm:$0xff]  ;;  %v1197_v9 = vld [vmem:[%s3014_s1 + $0xf0] sm:$0xff]  ;;  %v1196_v10 = vld [vmem:[%s3014_s1 + $0xe8] sm:$0xff]  ;;  %s1700_s28 = sld [smem:[#allocation4]]  ;;  %s3019_s23 = smov 112   ;;  %v1811_v50 = vand.u32 127, %v73_v31 }
  0x22   :  { %1231 = vmatprep.subr.mxu0 %v1198_v8  ;;  %1406 = vmatprep.subr.mxu1 %v1198_v8  ;;  %v1195_v11 = vld [vmem:[%s3014_s1 + $0xe0] sm:$0xff]  ;;  %v1194_v12 = vld [vmem:[%s3014_s1 + $0xd8] sm:$0xff]  ;;  %v1193_v13 = vld [vmem:[%s3014_s1 + $0xd0] sm:$0xff]  ;;  %s1705_s6 = sld [smem:[#allocation4 + $0x1]]  ;;  %v1783_v41 = vsub.s32 0, %v89_v35  ;;  %v1785_v42 = vsub.s32 1, %v89_v35 }
  0x23   :  { %61 = vrot.lane.b32.xlu1 %v1569_v2, %s1510_s30  ;;  %59 = vrot.lane.b32.xlu0 %v1574_v3, %s1510_s30  ;;  %v1192_v14 = vld [vmem:[%s3014_s1 + $0xc8] sm:$0xff]  ;;  %v1191_v15 = vld [vmem:[%s3014_s1 + $0xc0] sm:$0xff]  ;;  %s1714_s9 = sld [smem:[#allocation2]]  ;;  %v1787_v43 = vsub.s32 2, %v89_v35  ;;  %v1796_v46 = vsub.s32 3, %v89_v35  ;;  %v1813_v51 = vsub.s32 4, %v89_v35 }
  0x24   :  { %1232 = vmatpush1.msra.mxu0 %v1197_v9  ;;  %1438 = vmatpush1.msra.mxu1 %v1197_v9  ;;  %v1190_v16 = vld [vmem:[%s3014_s1 + $0xb8] sm:$0xff]  ;;  %v1189_v17 = vld [vmem:[%s3014_s1 + $0xb0] sm:$0xff]  ;;  %v1188_v18 = vld [vmem:[%s3014_s1 + $0xa8] sm:$0xff]  ;;  %s1719_s12 = sld [smem:[#allocation2 + $0x24]]  ;;  %v1824_v53 = vsub.s32 7, %v89_v35  ;;  %v1826_v54 = vsub.s32 5, %v89_v35 }
  0x25   :  { %1233 = vmatprep.subr.mxu0 %v1196_v10  ;;  %1407 = vmatprep.subr.mxu1 %v1196_v10  ;;  %v1187_v19 = vld [vmem:[%s3014_s1 + $0xa0] sm:$0xff]  ;;  %v1186_v20 = vld [vmem:[%s3014_s1 + $0x98] sm:$0xff]  ;;  %v1185_v21 = vld [vmem:[%s3014_s1 + $0x90] sm:$0xff]  ;;  %s1721_s13 = sld [smem:[#allocation2 + $0x9]]  ;;  %v1828_v55 = vsub.s32 6, %v89_v35  ;;  %vm75_vm0 = vcmp.lt.s32.totalorder %v1811_v50, 17 }
  0x26   :  { %1234 = vmatpush1.msra.mxu0 %v1195_v11  ;;  %1439 = vmatpush1.msra.mxu1 %v1195_v11  ;;  %v1184_v22 = vld [vmem:[%s3014_s1 + $0x88] sm:$0xff]  ;;  %v1183_v23 = vld [vmem:[%s3014_s1 + $0x80] sm:$0xff]  ;;  %v1182_v24 = vld [vmem:[%s3014_s1 + $0x78] sm:$0xff]  ;;  %s1726_s16 = sld [smem:[#allocation2 + $0x2d]]  ;;  %vm200_vm1 = vcmp.lt.s32.totalorder %v1811_v50, 16  ;;  %vm326_vm2 = vcmp.lt.s32.totalorder %v1811_v50, 15 }
  0x27   :  { %65 = vrot.lane.b32.xlu1 %v1581_v4, %s1510_s30  ;;  %63 = vrot.lane.b32.xlu0 %v1586_v5, %s1510_s30  ;;  %v1181_v25 = vld [vmem:[%s3014_s1 + $0x70] sm:$0xff]  ;;  %v1180_v26 = vld [vmem:[%s3014_s1 + $0x68] sm:$0xff]  ;;  %s1740_s21 = sld [smem:[#allocation2 + $0x36]]  ;;  %vm452_vm3 = vcmp.lt.s32.totalorder %v1811_v50, 1  ;;  %vm679_vm4 = vcmp.lt.s32.totalorder %v1811_v50, 127  ;;  %vm805_vm5 = vcmp.lt.s32.totalorder %v1811_v50, 113 }
  0x28   :  { %1235 = vmatprep.subr.mxu0 %v1194_v12  ;;  %1408 = vmatprep.subr.mxu1 %v1194_v12  ;;  %v1179_v27 = vld [vmem:[%s3014_s1 + $0x60] sm:$0xff]  ;;  %v1178_v28 = vld [vmem:[%s3014_s1 + $0x58] sm:$0xff]  ;;  %v1177_v29 = vld [vmem:[%s3014_s1 + $0x50] sm:$0xff]  ;;  %s1742_s22 = sld [smem:[#allocation2 + $0x1b]]  ;;  %v54_v57 = vstv %s1700_s28  ;;  %vm931_vm6 = vcmp.lt.s32.totalorder %v1811_v50, 112  ;;  %vm1057_vm7 = vcmp.lt.s32.totalorder %v1811_v50, 111 }
  0x29   :  { %1236 = vmatpush1.msra.mxu0 %v1193_v13  ;;  %1440 = vmatpush1.msra.mxu1 %v1193_v13  ;;  %v1176_v30 = vld [vmem:[%s3014_s1 + $0x48] sm:$0xff]  ;;  %v1175_v32 = vld [vmem:[%s3014_s1 + $0x40] sm:$0xff]  ;;  %v1174_v33 = vld [vmem:[%s3014_s1 + $0x38] sm:$0xff]  ;;  %s1747_s25 = sld [smem:[#allocation2 + $0x3f]]  ;;  %v56_v62 = vstv %s1705_s6 }
  0x2a   :  { %1237 = vmatprep.subr.mxu0 %v1192_v14  ;;  %1409 = vmatprep.subr.mxu1 %v1192_v14  ;;  %v1173_v34 = vld [vmem:[%s3014_s1 + $0x30] sm:$0xff]  ;;  %s1756_s27 = sld [smem:[#allocation2 + $0x1]]  ;;  %v1172_v36 = vld [vmem:[%s3014_s1 + $0x28] sm:$0xff]  ;;  %v1171_v39 = vld [vmem:[%s3014_s1 + $0x20] sm:$0xff]  ;;  %v137_v63 = vstv %s1714_s9 }
  0x2b   :  { %69 = vrot.lane.b32.xlu1 %v1593_v6, %s1510_s30  ;;  %67 = vrot.lane.b32.xlu0 %v1598_v7, %s1510_s30  ;;  %v84_v37 = vld [vmem:[%s3015_s2] ss:$8 sm:$0xf]  ;;  %s1764_s10 = sld [smem:[#allocation2 + $0x25]]  ;;  %v143_v12 = vstv %s1719_s12  ;;  %s3034_s30 = smov 111  }
  0x2c   :  { %1238 = vmatpush1.msra.mxu0 %v1191_v15  ;;  %1441 = vmatpush1.msra.mxu1 %v1191_v15  ;;  %v85_v38 = vld [vmem:[%s3015_s2] ss:$8 sm:$0xf0]  ;;  %s1789_s24 = sld [smem:[#allocation2 + $0x13]]  ;;  %v149_v13 = vstv %s1721_s13  ;;  %v155_v14 = vstv %s1726_s16 }
  0x2d   :  { %1239 = vmatprep.subr.mxu0 %v1190_v16  ;;  %1410 = vmatprep.subr.mxu1 %v1190_v16  ;;  %v1170_v40 = vld [vmem:[%s3014_s1 + $0x18] sm:$0xff]  ;;  %v1169_v44 = vld [vmem:[%s3014_s1 + $0x10] sm:$0xff]  ;;  %v1794_v45 = vor.u32 %v85_v38, %v84_v37  ;;  %s1801_s7 = sld [smem:[#allocation2 + $0x37]]  ;;  %v1168_v49 = vld [vmem:[%s3014_s1 + $0x8] sm:$0xff] }
  0x2e   :  { %1240 = vmatpush1.msra.mxu0 %v1189_v17  ;;  %1442 = vmatpush1.msra.mxu1 %v1189_v17  ;;  %3048 = sst [smem:[#allocation8_spill]] %s1742_s22  ;;  %v1326_v47 = vld [vmem:[%s3015_s2 + $0x1] ss:$8 sm:$0xf] }
  0x2f   :  { %186 = vrot.lane.b32.xlu1 %v1574_v3, %s1511_s18  ;;  %184 = vrot.lane.b32.xlu0 %v1562_v1, %s1511_s18  ;;  %v1327_v48 = vld [vmem:[%s3015_s2 + $0x1] ss:$8 sm:$0xf0]  ;;  %s1806_s14 = sld [smem:[#allocation2 + $0x1c]]  ;;  %v91_v58 = vrot.slane %v1794_v45, %v1783_v41  ;;  %v95_v59 = vrot.slane %v1794_v45, %v1785_v42  ;;  %v99_v8 = vrot.slane %v1794_v45, %v1787_v43 }
  0x30   :  { %1241 = vmatprep.subr.mxu0 %v1188_v18  ;;  %1411 = vmatprep.subr.mxu1 %v1188_v18  ;;  %v1167_v52 = vld [vmem:[%s3014_s1] sm:$0xff]  ;;  %v1230_v56 = vld [vmem:[%s3014_s1 + $0x1f8] sm:$0xff]  ;;  %v1840_v60 = vor.u32 %v1327_v48, %v1326_v47  ;;  %s1845_s15 = sld [smem:[#allocation2 + $0x26]]  ;;  %v103_v9 = vrot.slane %v1794_v45, %v1796_v46  ;;  %v1229_v11 = vld [vmem:[%s3014_s1 + $0x1f0] sm:$0xff]  ;;  %v107_v15 = vrot.slane %v1794_v45, %v1813_v51 }
  0x31   :  { %1242 = vmatpush1.msra.mxu0 %v1187_v19  ;;  %1443 = vmatpush1.msra.mxu1 %v1187_v19  ;;  %v1336_v61 = vld [vmem:[%s3015_s2 + $0x2] ss:$8 sm:$0xf]  ;;  %s1856_s26 = sld [smem:[#allocation2 + $0xb]]  ;;  %v119_v18 = vrot.slane %v1794_v45, %v1824_v53  ;;  %v111_v19 = vrot.slane %v1794_v45, %v1826_v54 }
  0x32   :  { %1243 = vmatprep.subr.mxu0 %v1186_v20  ;;  %1412 = vmatprep.subr.mxu1 %v1186_v20  ;;  %3049 = sst [smem:[#allocation9_spill]] %s1789_s24  ;;  %v1337_v10 = vld [vmem:[%s3015_s2 + $0x2] ss:$8 sm:$0xf0]  ;;  %v115_v20 = vrot.slane %v1794_v45, %v1828_v55 }
  0x33   :  { %188 = vrot.lane.b32.xlu1 %v1569_v2, %s1511_s18  ;;  %198 = vrot.lane.b32.xlu0 %v1557_v0, %s1511_s18  ;;  %3050 = sst [smem:[#allocation10_spill]] %s1801_s7  ;;  %v1228_v16 = vld [vmem:[%s3014_s1 + $0x1e8] sm:$0xff] }
  0x34   :  { %1244 = vmatpush1.msra.mxu0 %v1185_v21  ;;  %1444 = vmatpush1.msra.mxu1 %v1185_v21  ;;  %s1866_s8 = sld [smem:[#allocation2 + $0x2f]]  ;;  %v1227_v21 = vld [vmem:[%s3014_s1 + $0x1e0] sm:$0xff] }
  0x35   :  { %1245 = vmatprep.subr.mxu0 %v1184_v22  ;;  %1413 = vmatprep.subr.mxu1 %v1184_v22  ;;  %3051 = sst [smem:[#allocation11_spill]] %s1806_s14  ;;  %v167_v22 = vstv %s1740_s21  ;;  %v1357_v38 = vld [vmem:[%s3015_s2 + $0x4] ss:$8 sm:$0xf0] }
  0x36   :  { %1246 = vmatpush1.msra.mxu0 %v1183_v23  ;;  %1445 = vmatpush1.msra.mxu1 %v1183_v23  ;;  %3053 = sst [smem:[#allocation13_spill]] %s1845_s15  ;;  %s3057_s15 = smov 111  }
  0x37   :  { %192 = vrot.lane.b32.xlu1 %v1581_v4, %s1511_s18  ;;  %190 = vrot.lane.b32.xlu0 %v1586_v5, %s1511_s18  ;;  %s1882_s20 = sld [smem:[#allocation2 + $0x14]] }
  0x38   :  { %1247 = vmatprep.subr.mxu0 %v1182_v24  ;;  %1414 = vmatprep.subr.mxu1 %v1182_v24  ;;  %s1905_s29 = sld [smem:[#allocation2 + $0x38]] }
  0x39   :  { %1248 = vmatpush1.msra.mxu0 %v1181_v25  ;;  %1446 = vmatpush1.msra.mxu1 %v1181_v25  ;;  %v1891_v25 = vor.u32 %v1337_v10, %v1336_v61  ;;  %s1919_s11 = sld [smem:[#allocation2 + $0x1d]]  ;;  %v1221_v61 = vld [vmem:[%s3014_s1 + $0x1b0] sm:$0xff] }
  0x3a   :  { %1249 = vmatprep.subr.mxu0 %v1180_v26  ;;  %1415 = vmatprep.subr.mxu1 %v1180_v26  ;;  %v1346_v26 = vld [vmem:[%s3015_s2 + $0x3] ss:$8 sm:$0xf]  ;;  %s1938_s22 = sld [smem:[#allocation2 + $0x41]] }
  0x3b   :  { %196 = vrot.lane.b32.xlu1 %v1593_v6, %s1511_s18  ;;  %194 = vrot.lane.b32.xlu0 %v1598_v7, %s1511_s18  ;;  %s1774_s18 = sld [smem:[#allocation2 + $0x2e]] }
  0x3c   :  { %1250 = vmatpush1.msra.mxu0 %v1179_v27  ;;  %1447 = vmatpush1.msra.mxu1 %v1179_v27  ;;  %v1347_v27 = vld [vmem:[%s3015_s2 + $0x3] ss:$8 sm:$0xf0]  ;;  %s1950_s5 = sld [smem:[#allocation2 + $0x4]] }
  0x3d   :  { %1251 = vmatprep.subr.mxu0 %v1178_v28  ;;  %1416 = vmatprep.subr.mxu1 %v1178_v28  ;;  %v1948_v10 = vor.u32 %v1347_v27, %v1346_v26  ;;  %v1223_v26 = vld [vmem:[%s3014_s1 + $0x1c0] sm:$0xff]  ;;  %s1987_s7 = sld [smem:[#allocation2 + $0x31]] }
  0x3e   :  { %1252 = vmatpush1.msra.mxu0 %v1177_v29  ;;  %1448 = vmatpush1.msra.mxu1 %v1177_v29  ;;  %s2021_s14 = sld [smem:[#allocation2 + $0x16]] }
  0x3f   :  { %312 = vrot.lane.b32.xlu1 %v1574_v3, %s1512_s0  ;;  %310 = vrot.lane.b32.xlu0 %v1562_v1, %s1512_s0  ;;  %3054 = sst [smem:[#allocation14_spill]] %s1919_s11 }
  0x40   :  { %1253 = vmatprep.subr.mxu0 %v1176_v30  ;;  %1417 = vmatprep.subr.mxu1 %v1176_v30  ;;  %s2048_s17 = sld [smem:[#allocation2 + $0x3a]] }
  0x41   :  { %1254 = vmatpush1.msra.mxu0 %v1175_v32  ;;  %1449 = vmatpush1.msra.mxu1 %v1175_v32  ;;  %v1356_v32 = vld [vmem:[%s3015_s2 + $0x4] ss:$8 sm:$0xf]  ;;  %s2051_s24 = sld [smem:[#allocation2 + $0x27]] }
  0x42   :  { %1255 = vmatprep.subr.mxu0 %v1174_v33  ;;  %1418 = vmatprep.subr.mxu1 %v1174_v33  ;;  %v1226_v33 = vld [vmem:[%s3014_s1 + $0x1d8] sm:$0xff]  ;;  %s2073_s11 = sld [smem:[#allocation2 + $0x1f]] }
  0x43   :  { %314 = vrot.lane.b32.xlu1 %v1569_v2, %s1512_s0  ;;  %324 = vrot.lane.b32.xlu0 %v1557_v0, %s1512_s0  ;;  %s2201_s9 = sld [smem:[#allocation2 + $0x1e]] }
  0x44   :  { %1256 = vmatpush1.msra.mxu0 %v1173_v34  ;;  %1450 = vmatpush1.msra.mxu1 %v1173_v34  ;;  %v640_v23 = vstv %s2021_s14  ;;  %s2223_s12 = sld [smem:[#allocation2 + $0x42]] }
  0x45   :  { %1257 = vmatprep.subr.mxu0 %v1172_v36  ;;  %1419 = vmatprep.subr.mxu1 %v1172_v36  ;;  %s2250_s28 = sld [smem:[#allocation2 + $0x5]] }
  0x46   :  { %1258 = vmatpush1.msra.mxu0 %v1171_v39  ;;  %1451 = vmatpush1.msra.mxu1 %v1171_v39  ;;  %v1225_v39 = vld [vmem:[%s3014_s1 + $0x1d0] sm:$0xff]  ;;  %s2297_s16 = sld [smem:[#allocation2 + $0xe]] }
  0x47   :  { %318 = vrot.lane.b32.xlu1 %v1581_v4, %s1512_s0  ;;  %316 = vrot.lane.b32.xlu0 %v1586_v5, %s1512_s0  ;;  %3058 = sst [smem:[#allocation16_spill]] %s2051_s24 }
  0x48   :  { %1259 = vmatprep.subr.mxu0 %v1170_v40  ;;  %1420 = vmatprep.subr.mxu1 %v1170_v40  ;;  %s2180_s24 = sld [smem:[#allocation2 + $0x39]] }
  0x49   :  { %1260 = vmatpush1.msra.mxu0 %v1169_v44  ;;  %1452 = vmatpush1.msra.mxu1 %v1169_v44  ;;  %v1956_v44 = vor.u32 %v1357_v38, %v1356_v32  ;;  %v1366_v32 = vld [vmem:[%s3015_s2 + $0x5] ss:$8 sm:$0xf]  ;;  %s2386_s14 = sld [smem:[#allocation2 + $0x17]] }
  0x4a   :  { %1261 = vmatprep.subr.mxu0 %v1168_v49  ;;  %1421 = vmatprep.subr.mxu1 %v1168_v49  ;;  %v1224_v49 = vld [vmem:[%s3014_s1 + $0x1c8] sm:$0xff]  ;;  %v1222_v38 = vld [vmem:[%s3014_s1 + $0x1b8] sm:$0xff]  ;;  %s2549_s21 = sld [smem:[#allocation2 + $0xf]] }
  0x4b   :  { %322 = vrot.lane.b32.xlu1 %v1593_v6, %s1512_s0  ;;  %320 = vrot.lane.b32.xlu0 %v1598_v7, %s1512_s0  ;;  %s1735_s0 = sld [smem:[#allocation2 + $0x12]]  ;;  %v582_v27 = vrot.slane %v1956_v44, %v1796_v46 }
  0x4c   :  { %1262 = vmatpush1.msra.mxu0 %v1167_v52  ;;  %1453 = vmatpush1.msra.mxu1 %v1167_v52  ;;  %s2559_s13 = sld [smem:[#allocation2 + $0x33]] }
  0x4d   :  { %1263 = vmatprep.subr.mxu0 %v1230_v56  ;;  %1422 = vmatprep.subr.mxu1 %v1230_v56  ;;  %v610_v30 = vmul.f32 %v582_v27, %v1586_v5 }
  0x4e   :  { %1264 = vmatpush2.msra.mxu0 %v1229_v11  ;;  %1454 = vmatpush2.msra.mxu1 %v1229_v11 }
  0x4f   :  { %438 = vrot.lane.b32.xlu1 %v1574_v3, %s1513_s19  ;;  %436 = vrot.lane.b32.xlu0 %v1562_v1, %s1513_s19 }
  0x50   :  { %1265 = vmatprep.subr.mxu0 %v1228_v16  ;;  %1423 = vmatprep.subr.mxu1 %v1228_v16  ;;  %v1367_v16 = vld [vmem:[%s3015_s2 + $0x5] ss:$8 sm:$0xf0]  ;;  %s2693_s2 = sld [smem:[#allocation2 + $0x19]] }
  0x51   :  { %v161_v17 = vstv %s1735_s0  ;;  %1266 = vmatpush2.msra.mxu0 %v1227_v21  ;;  %1455 = vmatpush2.msra.mxu1 %v1227_v21  ;;  %v578_v21 = vrot.slane %v1956_v44, %v1787_v43  ;;  %v2023_v52 = vor.u32 %v1367_v16, %v1366_v32  ;;  %v1218_v32 = vld [vmem:[%s3014_s1 + $0x198] sm:$0xff]  ;;  %s3112_s0 = sld [smem:[#allocation14_spill]] }
  0x52   :  { %1267 = vmatprep.subr.mxu0 %v1226_v33  ;;  %1424 = vmatprep.subr.mxu1 %v1226_v33 }
  0x53   :  { %440 = vrot.lane.b32.xlu1 %v1569_v2, %s1513_s19  ;;  %450 = vrot.lane.b32.xlu0 %v1557_v0, %s1513_s19  ;;  %v609_v40 = vmul.f32 %v578_v21, %v1569_v2  ;;  %v598_v21 = vrot.slane %v1956_v44, %v1824_v53 }
  0x54   :  { %1268 = vmatpush2.msra.mxu0 %v1225_v39  ;;  %1456 = vmatpush2.msra.mxu1 %v1225_v39  ;;  %v570_v39 = vrot.slane %v1956_v44, %v1783_v41 }
  0x55   :  { %1269 = vmatprep.subr.mxu0 %v1224_v49  ;;  %1425 = vmatprep.subr.mxu1 %v1224_v49  ;;  %v574_v49 = vrot.slane %v1956_v44, %v1785_v42 }
  0x56   :  { %1270 = vmatpush2.msra.mxu0 %v1223_v26  ;;  %1457 = vmatpush2.msra.mxu1 %v1223_v26  ;;  %v1220_v26 = vld [vmem:[%s3014_s1 + $0x1a8] sm:$0xff]  ;;  %v607_v48 = vmul.f32 %v570_v39, %v1562_v1  ;;  %v586_v39 = vrot.slane %v1956_v44, %v1813_v51 }
  0x57   :  { %444 = vrot.lane.b32.xlu1 %v1581_v4, %s1513_s19  ;;  %442 = vrot.lane.b32.xlu0 %v1586_v5, %s1513_s19  ;;  %v608_v56 = vmul.f32 %v574_v49, %v1574_v3  ;;  %v1217_v49 = vld [vmem:[%s3014_s1 + $0x190] sm:$0xff] }
  0x58   :  { %1271 = vmatprep.subr.mxu0 %v1222_v38  ;;  %1426 = vmatprep.subr.mxu1 %v1222_v38  ;;  %v1219_v38 = vld [vmem:[%s3014_s1 + $0x1a0] sm:$0xff] }
  0x59   :  { %1272 = vmatpush2.msra.mxu0 %v1221_v61  ;;  %1458 = vmatpush2.msra.mxu1 %v1221_v61 }
  0x5a   :  { %1273 = vmatprep.subr.mxu0 %v1220_v26  ;;  %1427 = vmatprep.subr.mxu1 %v1220_v26  ;;  %v616_v26 = vstv %s1950_s5  ;;  %s2139_s5 = sld [smem:[#allocation2 + $0x15]] }
  0x5b   :  { %448 = vrot.lane.b32.xlu1 %v1593_v6, %s1513_s19  ;;  %446 = vrot.lane.b32.xlu0 %v1598_v7, %s1513_s19  ;;  %s1815_s19 = sld [smem:[#allocation2 + $0x40]]  ;;  %v2083_v37 = vmul.f32 %v616_v26, %v608_v56  ;;  %v2094_v31 = vmul.f32 %v616_v26, %v607_v48 }
  0x5c   :  { %1274 = vmatpush2.msra.mxu0 %v1219_v38  ;;  %1459 = vmatpush2.msra.mxu1 %v1219_v38  ;;  %v1216_v38 = vld [vmem:[%s3014_s1 + $0x188] sm:$0xff] }
  0x5d   :  { %1275 = vmatprep.subr.mxu0 %v1218_v32  ;;  %1428 = vmatprep.subr.mxu1 %v1218_v32 }
  0x5e   :  { %1276 = vmatpush2.msra.mxu0 %v1217_v49  ;;  %1460 = vmatpush2.msra.mxu1 %v1217_v49  ;;  %v646_v49 = vstv %s2048_s17  ;;  %s3089_s17 = sld [smem:[#allocation13_spill]] }
  0x5f   :  { %667 = vrot.lane.b32.xlu1 %v1569_v2, %s1514_s4  ;;  %665 = vrot.lane.b32.xlu0 %v1574_v3, %s1514_s4 }
  0x60   :  { %1277 = vmatprep.subr.mxu0 %v1216_v38  ;;  %1429 = vmatprep.subr.mxu1 %v1216_v38 }
  0x61   :  { %3052 = sst [smem:[#allocation12_spill]] %s1815_s19 }
  0x62   :  { %s1969_s19 = sld [smem:[#allocation2 + $0xd]] }
  0x63   :  { %669 = vrot.lane.b32.xlu1 %v1586_v5, %s1514_s4  ;;  %663 = vrot.lane.b32.xlu0 %v1562_v1, %s1514_s4 }
  0x67   :  { %673 = vrot.lane.b32.xlu1 %v1598_v7, %s1514_s4  ;;  %671 = vrot.lane.b32.xlu0 %v1581_v4, %s1514_s4 }
  0x68   :  { %v628_v47 = vstv %s1969_s19  ;;  %s2108_s19 = sld [smem:[#allocation2 + $0x43]] }
  0x69   :  { %v2092_v28 = vmul.f32 %v628_v47, %v609_v40 }
  0x6b   :  { %677 = vrot.lane.b32.xlu1 %v1557_v0, %s1514_s4  ;;  %675 = vrot.lane.b32.xlu0 %v1593_v6, %s1514_s4  ;;  %s1830_s4 = sld [smem:[#allocation2 + $0x2]] }
  0x6f   :  { %793 = vrot.lane.b32.xlu1 %v1569_v2, %s1515_s3  ;;  %791 = vrot.lane.b32.xlu0 %v1574_v3, %s1515_s3 }
  0x73   :  { %795 = vrot.lane.b32.xlu1 %v1586_v5, %s1515_s3  ;;  %789 = vrot.lane.b32.xlu0 %v1562_v1, %s1515_s3 }
  0x77   :  { %799 = vrot.lane.b32.xlu1 %v1598_v7, %s1515_s3  ;;  %797 = vrot.lane.b32.xlu0 %v1581_v4, %s1515_s3 }
  0x7b   :  { %803 = vrot.lane.b32.xlu1 %v1557_v0, %s1515_s3  ;;  %801 = vrot.lane.b32.xlu0 %v1593_v6, %s1515_s3  ;;  %s1769_s3 = sld [smem:[#allocation2 + $0xa]] }
  0x7f   :  { %919 = vrot.lane.b32.xlu1 %v1569_v2, %s3019_s23  ;;  %917 = vrot.lane.b32.xlu0 %v1574_v3, %s3019_s23 }
  0x83   :  { %921 = vrot.lane.b32.xlu1 %v1586_v5, %s3019_s23  ;;  %915 = vrot.lane.b32.xlu0 %v1562_v1, %s3019_s23 }
  0x87   :  { %925 = vrot.lane.b32.xlu1 %v1598_v7, %s3019_s23  ;;  %923 = vrot.lane.b32.xlu0 %v1581_v4, %s3019_s23  ;;  %s3055_s23 = smov 112  }
  0x8b   :  { %929 = vrot.lane.b32.xlu1 %v1557_v0, %s3055_s23  ;;  %927 = vrot.lane.b32.xlu0 %v1593_v6, %s3055_s23  ;;  %s1958_s23 = sld [smem:[#allocation2 + $0x28]] }
  0x8f   :  { %1045 = vrot.lane.b32.xlu1 %v1569_v2, %s3034_s30  ;;  %1043 = vrot.lane.b32.xlu0 %v1574_v3, %s3034_s30  ;;  %s2000_s30 = sld [smem:[#allocation2 + $0x3]]  ;;  %v590_v3 = vrot.slane %v1956_v44, %v1826_v54  ;;  %v634_v2 = vstv %s1987_s7 }
  0x90   :  { %v2103_v27 = vmul.f32 %v634_v2, %v609_v40  ;;  %v594_v40 = vrot.slane %v1956_v44, %v1828_v55  ;;  %v1213_v44 = vld [vmem:[%s3014_s1 + $0x170] sm:$0xff]  ;;  %v2141_v26 = vmul.f32 %v634_v2, %v610_v30  ;;  %s3111_s7 = sld [smem:[#allocation18_spill]] }
  0x91   :  { %v2004_v11 = vpop.permute.xlu1 %71  ;;  %v58_v33 = vpop.permute.xlu0 %57  ;;  %v622_v35 = vstv %s1958_s23  ;;  %s2090_s23 = sld [smem:[#allocation2 + $0xc]]  ;;  %v612_v32 = vmul.f32 %v590_v3, %v1598_v7 }
  0x92   :  { %v2085_v36 = vmul.f32 %v622_v35, %v608_v56  ;;  %v1215_v56 = vld [vmem:[%s3014_s1 + $0x180] sm:$0xff] }
  0x93   :  { %1047 = vrot.lane.b32.xlu1 %v1586_v5, %s3057_s15  ;;  %1041 = vrot.lane.b32.xlu0 %v1562_v1, %s3057_s15  ;;  %v83_v1 = vsel %vm75_vm0, %v2004_v11, %v58_v33 }
  0x94   :  { %v128_v5 = vmul.f32 %v91_v58, %v83_v1  ;;  %v614_v58 = vmul.f32 %v598_v21, %v1557_v0  ;;  %1278 = vmatpush2.msra.mxu0 %v1215_v56  ;;  %v2145_v1 = vmul.f32 %v640_v23, %v612_v32  ;;  %1461 = vmatpush2.msra.mxu1 %v1215_v56  ;;  %v1212_v21 = vld [vmem:[%s3014_s1 + $0x168] sm:$0xff]  ;;  %v1211_v56 = vld [vmem:[%s3014_s1 + $0x160] sm:$0xff] }
  0x95   :  { %3056 = sst [smem:[#allocation15_spill]] %s2000_s30  ;;  %v62_v61 = vpop.permute.xlu1 %61  ;;  %v60_v16 = vpop.permute.xlu0 %59 }
  0x96   :  { %v82_v34 = vsel %vm75_vm0, %v58_v33, %v60_v16  ;;  %v2105_v33 = vmul.f32 %v622_v35, %v607_v48  ;;  %v81_v3 = vsel %vm75_vm0, %v60_v16, %v62_v61  ;;  %s2130_s30 = sld [smem:[#allocation2 + $0x30]]  ;;  %v138_v38 = vmul.f32 %v137_v63, %v128_v5 }
  0x97   :  { %1051 = vrot.lane.b32.xlu1 %v1598_v7, %s3057_s15  ;;  %1049 = vrot.lane.b32.xlu0 %v1581_v4, %s3057_s15  ;;  %3059 = sst [smem:[#allocation17_spill]] %s2090_s23  ;;  %v1214_v7 = vld [vmem:[%s3014_s1 + $0x178] sm:$0xff]  ;;  %v129_v48 = vmul.f32 %v95_v59, %v82_v34  ;;  %v144_v35 = vmul.f32 %v143_v12, %v128_v5 }
  0x98   :  { %1279 = vmatprep.subr.mxu0 %v1214_v7  ;;  %1430 = vmatprep.subr.mxu1 %v1214_v7  ;;  %s3060_s23 = sld [smem:[#allocation8_spill]] }
  0x99   :  { %v66_v29 = vpop.permute.xlu1 %65  ;;  %v64_v24 = vpop.permute.xlu0 %63  ;;  %1280 = vmatpush2.msra.mxu0 %v1213_v44  ;;  %1462 = vmatpush2.msra.mxu1 %v1213_v44  ;;  %v145_v7 = vmul.f32 %v143_v12, %v129_v48  ;;  %v1209_v12 = vld [vmem:[%s3014_s1 + $0x150] sm:$0xff] }
  0x9a   :  { %v80_v16 = vsel %vm75_vm0, %v62_v61, %v64_v24  ;;  %v79_v2 = vsel %vm75_vm0, %v64_v24, %v66_v29  ;;  %v652_v24 = vstv %s2073_s11  ;;  %1281 = vmatprep.subr.mxu0 %v1212_v21  ;;  %1431 = vmatprep.subr.mxu1 %v1212_v21  ;;  %v1208_v21 = vld [vmem:[%s3014_s1 + $0x148] sm:$0xff]  ;;  %s2438_s11 = sld [smem:[#allocation2 + $0x3b]] }
  0x9b   :  { %1055 = vrot.lane.b32.xlu1 %v1557_v0, %s3057_s15  ;;  %1053 = vrot.lane.b32.xlu0 %v1593_v6, %s3057_s15  ;;  %v2132_v0 = vmul.f32 %v628_v47, %v610_v30  ;;  %v2149_v47 = vmul.f32 %v646_v49, %v612_v32  ;;  %v130_v30 = vmul.f32 %v99_v8, %v81_v3  ;;  %s2259_s15 = sld [smem:[#allocation2 + $0x29]] }
  0x9c   :  { %v2162_v32 = vmul.f32 %v586_v39, %v1581_v4  ;;  %v131_v61 = vmul.f32 %v103_v9, %v80_v16  ;;  %v1210_v4 = vld [vmem:[%s3014_s1 + $0x158] sm:$0xff]  ;;  %v139_v39 = vmul.f32 %v137_v63, %v129_v48  ;;  %v2184_v5 = vmul.f32 %v652_v24, %v614_v58  ;;  %1282 = vmatpush2.msra.mxu0 %v1211_v56 }
  0x9d   :  { %v70_v59 = vpop.permute.xlu1 %69  ;;  %v68_v34 = vpop.permute.xlu0 %67  ;;  %v2187_v9 = vmul.f32 %v594_v40, %v1593_v6  ;;  %v132_v63 = vmul.f32 %v107_v15, %v79_v2  ;;  %v150_v15 = vmul.f32 %v149_v13, %v130_v30  ;;  %v156_v48 = vmul.f32 %v155_v14, %v130_v30  ;;  %1463 = vmatpush2.msra.mxu1 %v1211_v56  ;;  %v1207_v56 = vld [vmem:[%s3014_s1 + $0x140] sm:$0xff] }
  0x9e   :  { %v78_v8 = vsel %vm75_vm0, %v66_v29, %v68_v34  ;;  %v77_v3 = vsel %vm75_vm0, %v68_v34, %v70_v59  ;;  %v658_v34 = vstv %s2108_s19  ;;  %1283 = vmatprep.subr.mxu0 %v1210_v4  ;;  %v140_v2 = vadd.f32 %v138_v38, %v54_v57  ;;  %1432 = vmatprep.subr.mxu1 %v1210_v4  ;;  %s2467_s19 = sld [smem:[#allocation2 + $0x44]] }
  0x9f   :  { %v133_v44 = vmul.f32 %v111_v19, %v78_v8  ;;  %v146_v29 = vadd.f32 %v144_v35, %v56_v62  ;;  %v151_v30 = vmul.f32 %v149_v13, %v131_v61  ;;  %v2227_v19 = vmul.f32 %v658_v34, %v614_v58  ;;  %1284 = vmatpush2.msra.mxu0 %v1209_v12 }
  0xa0   :  { %v141_v8 = vadd.f32 %v139_v39, %v54_v57  ;;  %v157_v38 = vmul.f32 %v155_v14, %v131_v61  ;;  %v134_v13 = vmul.f32 %v115_v20, %v77_v3  ;;  %v533_v35 = vstv %s2130_s30  ;;  %1464 = vmatpush2.msra.mxu1 %v1209_v12  ;;  %1285 = vmatprep.subr.mxu0 %v1208_v21  ;;  %v1206_v20 = vld [vmem:[%s3014_s1 + $0x138] sm:$0xff]  ;;  %s2571_s30 = sld [smem:[#allocation2 + $0x18]] }
  0xa1   :  { %v2198_v16 = vpop.permute.xlu1 %186  ;;  %v185_v6 = vpop.permute.xlu0 %184  ;;  %v162_v58 = vmul.f32 %v161_v17, %v132_v63  ;;  %v168_v4 = vmul.f32 %v167_v22, %v132_v63  ;;  %v76_v40 = vsel %vm75_vm0, %v70_v59, %v2004_v11  ;;  %1433 = vmatprep.subr.mxu1 %v1208_v21  ;;  %v147_v61 = vadd.f32 %v145_v7, %v56_v62  ;;  %v1205_v59 = vld [vmem:[%s3014_s1 + $0x130] sm:$0xff] }
  0xa2   :  { %v152_v63 = vadd.f32 %v150_v15, %v140_v2  ;;  %v158_v3 = vadd.f32 %v156_v48, %v146_v29  ;;  %v163_v11 = vmul.f32 %v161_v17, %v133_v44  ;;  %1286 = vmatpush2.msra.mxu0 %v1207_v56  ;;  %v153_v12 = vadd.f32 %v151_v30, %v141_v8  ;;  %v1204_v17 = vld [vmem:[%s3014_s1 + $0x128] sm:$0xff] }
  0xa3   :  { %v169_v21 = vmul.f32 %v167_v22, %v133_v44  ;;  %v207_v14 = vsel %vm200_vm1, %v185_v6, %v2198_v16  ;;  %1465 = vmatpush2.msra.mxu1 %v1207_v56  ;;  %v135_v29 = vmul.f32 %v119_v18, %v76_v40  ;;  %v3061_v7 = vstv %s3060_s23  ;;  %1287 = vmatprep.subr.mxu0 %v1206_v20 }
  0xa4   :  { %v174_v22 = vmul.f32 %v3061_v7, %v134_v13  ;;  %v3062_v15 = vrot.slane %v1840_v60, %v1783_v41  ;;  %v545_v44 = vstv %s2180_s24  ;;  %1434 = vmatprep.subr.mxu1 %v1206_v20  ;;  %v159_v2 = vadd.f32 %v157_v38, %v147_v61  ;;  %1288 = vmatpush2.msra.mxu0 %v1205_v59 }
  0xa5   :  { %v189_v57 = vpop.permute.xlu1 %188  ;;  %v2247_v39 = vpop.permute.xlu0 %198  ;;  %v164_v30 = vadd.f32 %v162_v58, %v152_v63  ;;  %v170_v56 = vadd.f32 %v168_v4, %v158_v3  ;;  %v551_v40 = vstv %s2201_s9  ;;  %1466 = vmatpush2.msra.mxu1 %v1205_v59  ;;  %v165_v8 = vadd.f32 %v163_v11, %v153_v12  ;;  %1289 = vmatprep.subr.mxu0 %v1204_v17  ;;  %v1202_v4 = vld [vmem:[%s3014_s1 + $0x118] sm:$0xff] }
  0xa6   :  { %v208_v62 = vsel %vm200_vm1, %v2247_v39, %v185_v6  ;;  %v1203_v6 = vld [vmem:[%s3014_s1 + $0x120] sm:$0xff]  ;;  %v3063_v20 = vstv %s1747_s25  ;;  %v3064_v7 = vrot.slane %v1840_v60, %v1785_v42  ;;  %v206_v58 = vsel %vm200_vm1, %v2198_v16, %v189_v57  ;;  %1435 = vmatprep.subr.mxu1 %v1204_v17  ;;  %v1201_v16 = vld [vmem:[%s3014_s1 + $0x110] sm:$0xff]  ;;  %s2516_s25 = sld [smem:[#allocation2 + $0x6]] }
  0xa7   :  { %v254_v48 = vmul.f32 %v3062_v15, %v208_v62  ;;  %v180_v62 = vmul.f32 %v3063_v20, %v134_v13  ;;  %v171_v61 = vadd.f32 %v169_v21, %v159_v2  ;;  %v3065_v63 = vstv %s1756_s27  ;;  %1290 = vmatpush2.msra.mxu0 %v1203_v6  ;;  %1467 = vmatpush2.msra.mxu1 %v1203_v6 }
  0xa8   :  { %v255_v38 = vmul.f32 %v3064_v7, %v207_v14  ;;  %v3066_v14 = vstv %s3060_s23  ;;  %v3067_v12 = vmov %v3063_v20  ;;  %v176_v21 = vadd.f32 %v174_v22, %v164_v30  ;;  %1291 = vmatprep.subr.mxu0 %v1202_v4  ;;  %1436 = vmatprep.subr.mxu1 %v1202_v4  ;;  %v1200_v22 = vld [vmem:[%s3014_s1 + $0x108] sm:$0xff]  ;;  %s2525_s23 = sld [smem:[#allocation2 + $0x2a]] }
  0xa9   :  { %v193_v45 = vpop.permute.xlu1 %192  ;;  %v191_v18 = vpop.permute.xlu0 %190  ;;  %v264_v3 = vmul.f32 %v3065_v63, %v254_v48  ;;  %v175_v59 = vmul.f32 %v3066_v14, %v135_v29  ;;  %v181_v15 = vmul.f32 %v3067_v12, %v135_v29  ;;  %v3068_v2 = vstv %s1764_s10  ;;  %1292 = vmatpush2.msra.mxu0 %v1201_v16  ;;  %1468 = vmatpush2.msra.mxu1 %v1201_v16 }
  0xaa   :  { %v205_v13 = vsel %vm200_vm1, %v189_v57, %v191_v18  ;;  %v270_v20 = vmul.f32 %v3068_v2, %v254_v48  ;;  %v3069_v57 = vrot.slane %v1840_v60, %v1787_v43  ;;  %v204_v7 = vsel %vm200_vm1, %v191_v18, %v193_v45  ;;  %1293 = vmatprep.subr.mxu0 %v1200_v22 }
  0xab   :  { %v3070_v63 = vrot.slane %v1840_v60, %v1796_v46  ;;  %v742_v12 = vstv %s2250_s28  ;;  %v182_v48 = vadd.f32 %v180_v62, %v170_v56  ;;  %v177_v6 = vadd.f32 %v175_v59, %v165_v8  ;;  %v1199_v56 = vld [vmem:[%s3014_s1 + $0x100] sm:$0xff]  ;;  %s3076_s1 = sld [smem:[#allocation9_spill]]  ;;  %1437 = vmatprep.subr.mxu1 %v1200_v22 }
  0xac   :  { %v256_v17 = vmul.f32 %v3069_v57, %v206_v58  ;;  %v3071_v30 = vstv %s1756_s27  ;;  %v183_v2 = vadd.f32 %v181_v15, %v171_v61  ;;  %v2336_v4 = vmul.f32 %v640_v23, %v2162_v32  ;;  %s2346_s27 = sld [smem:[#allocation2 + $0x32]]  ;;  %1294 = vmatpush2.msra.mxu0 %v1199_v56  ;;  %1469 = vmatpush2.msra.mxu1 %v1199_v56 }
  0xad   :  { %v257_v14 = vmul.f32 %v3070_v63, %v205_v13  ;;  %v197_v11 = vpop.permute.xlu1 %196  ;;  %v195_v29 = vpop.permute.xlu0 %194  ;;  %v265_v18 = vmul.f32 %v3071_v30, %v255_v38  ;;  %v3072_v13 = vstv %s1764_s10  ;;  %v266_v63 = vadd.f32 %v264_v3, %v176_v21  ;;  %s3078_s10 = sld [smem:[#allocation10_spill]] }
  0xae   :  { %v271_v57 = vmul.f32 %v3072_v13, %v255_v38  ;;  %v272_v8 = vadd.f32 %v270_v20, %v182_v48  ;;  %v3073_v62 = vrot.slane %v1840_v60, %v1813_v51  ;;  %v203_v38 = vsel %vm200_vm1, %v193_v45, %v195_v29  ;;  %s2710_s28 = sld [smem:[#allocation2 + $0x3d]] }
  0xaf   :  { %v2351_v23 = vmul.f32 %v646_v49, %v2162_v32  ;;  %v3074_v61 = vstv %s1769_s3  ;;  %v202_v21 = vsel %vm200_vm1, %v195_v29, %v197_v11  ;;  %v3077_v20 = vrot.slane %v1840_v60, %v1826_v54  ;;  %s3085_s3 = sld [smem:[#allocation11_spill]] }
  0xb0   :  { %v258_v59 = vmul.f32 %v3073_v62, %v204_v7  ;;  %v276_v3 = vmul.f32 %v3074_v61, %v256_v17  ;;  %v3075_v16 = vmov %v3074_v61  ;;  %v267_v49 = vadd.f32 %v265_v18, %v177_v6 }
  0xb1   :  { %v277_v15 = vmul.f32 %v3075_v16, %v257_v14  ;;  %v259_v45 = vmul.f32 %v3077_v20, %v203_v38  ;;  %v313_v7 = vpop.permute.xlu1 %312  ;;  %v311_v48 = vpop.permute.xlu0 %310  ;;  %v3079_v32 = vstv %s1774_s18  ;;  %v201_v13 = vsel %vm200_vm1, %v197_v11, %v2247_v39  ;;  %s3087_s18 = sld [smem:[#allocation12_spill]] }
  0xb2   :  { %v282_v30 = vmul.f32 %v3079_v32, %v256_v17  ;;  %v754_v62 = vstv %s2297_s16  ;;  %v273_v29 = vadd.f32 %v271_v57, %v183_v2  ;;  %v278_v61 = vadd.f32 %v276_v3, %v266_v63  ;;  %s2757_s16 = sld [smem:[#allocation2 + $0x46]] }
  0xb3   :  { %v3080_v16 = vmov %v3079_v32  ;;  %v3081_v20 = vstv %s3076_s1  ;;  %v3083_v17 = vrot.slane %v1840_v60, %v1828_v55  ;;  %v333_v39 = vsel %vm326_vm2, %v311_v48, %v313_v7  ;;  %s2581_s1 = sld [smem:[#allocation2 + $0x3c]] }
  0xb4   :  { %v283_v38 = vmul.f32 %v3080_v16, %v257_v14  ;;  %v289_v22 = vmul.f32 %v3081_v20, %v259_v45  ;;  %v284_v58 = vadd.f32 %v282_v30, %v272_v8  ;;  %v3082_v6 = vmov %v3081_v20 }
  0xb5   :  { %v288_v18 = vmul.f32 %v3082_v6, %v258_v59  ;;  %v260_v32 = vmul.f32 %v3083_v17, %v202_v21  ;;  %v279_v11 = vadd.f32 %v277_v15, %v267_v49  ;;  %v3084_v56 = vstv %s3078_s10  ;;  %v315_v3 = vpop.permute.xlu1 %314  ;;  %v325_v30 = vpop.permute.xlu0 %324  ;;  %s2591_s10 = sld [smem:[#allocation2 + $0x21]] }
  0xb6   :  { %v294_v2 = vmul.f32 %v3084_v56, %v258_v59  ;;  %v3086_v57 = vrot.slane %v1840_v60, %v1824_v53  ;;  %v3088_v63 = vmov %v3084_v56  ;;  %v334_v21 = vsel %vm326_vm2, %v325_v30, %v311_v48 }
  0xb7   :  { %v295_v8 = vmul.f32 %v3088_v63, %v259_v45  ;;  %v2393_v15 = vmul.f32 %v652_v24, %v2187_v9  ;;  %v2398_v60 = vmul.f32 %v658_v34, %v2187_v9  ;;  %v708_v59 = vrot.slane %v2023_v52, %v1796_v46 }
  0xb8   :  { %v261_v14 = vmul.f32 %v3086_v57, %v201_v13  ;;  %v285_v45 = vadd.f32 %v283_v38, %v273_v29  ;;  %v291_v49 = vadd.f32 %v289_v22, %v279_v11  ;;  %v3090_v13 = vrot.slane %v1891_v25, %v1785_v42 }
  0xb9   :  { %v3091_v48 = vrot.slane %v1891_v25, %v1783_v41  ;;  %v290_v20 = vadd.f32 %v288_v18, %v278_v61  ;;  %v3092_v6 = vstv %s3085_s3  ;;  %v3093_v34 = vstv %s3087_s18  ;;  %v317_v63 = vpop.permute.xlu0 %316  ;;  %s2617_s18 = sld [smem:[#allocation2 + $0x7]] }
  0xba   :  { %v381_v16 = vmul.f32 %v3090_v13, %v333_v39  ;;  %v300_v9 = vmul.f32 %v3092_v6, %v260_v32  ;;  %v306_v17 = vmul.f32 %v3093_v34, %v260_v32  ;;  %v296_v57 = vadd.f32 %v294_v2, %v284_v58  ;;  %v319_v39 = vpop.permute.xlu1 %318 }
  0xbb   :  { %v380_v24 = vmul.f32 %v3091_v48, %v334_v21  ;;  %v3094_v29 = vmov %v3092_v6  ;;  %v297_v22 = vadd.f32 %v295_v8, %v285_v45  ;;  %v332_v11 = vsel %vm326_vm2, %v313_v7, %v315_v3 }
  0xbc   :  { %v301_v38 = vmul.f32 %v3094_v29, %v261_v14  ;;  %v3095_v21 = vstv %s1830_s4  ;;  %v3096_v18 = vstv %s3089_s17  ;;  %v330_v32 = vsel %vm326_vm2, %v317_v63, %v319_v39  ;;  %s2456_s4 = sld [smem:[#allocation2 + $0x20]] }
  0xbd   :  { %v390_v61 = vmul.f32 %v3095_v21, %v380_v24  ;;  %v396_v13 = vmul.f32 %v3096_v18, %v380_v24  ;;  %v331_v58 = vsel %vm326_vm2, %v315_v3, %v317_v63  ;;  %v3097_v2 = vmov %v3093_v34 }
  0xbe   :  { %v307_v8 = vmul.f32 %v3097_v2, %v261_v14  ;;  %v303_v45 = vadd.f32 %v301_v38, %v291_v49  ;;  %v3098_v7 = vmov %v3095_v21  ;;  %v3099_v6 = vrot.slane %v1891_v25, %v1796_v46 }
  0xbf   :  { %v391_v48 = vmul.f32 %v3098_v7, %v381_v16  ;;  %v302_v29 = vadd.f32 %v300_v9, %v290_v20  ;;  %v308_v21 = vadd.f32 %v306_v17, %v296_v57  ;;  %v3100_v24 = vrot.slane %v1891_v25, %v1787_v43  ;;  %v323_v17 = vpop.permute.xlu1 %322  ;;  %v321_v57 = vpop.permute.xlu0 %320 }
  0xc0   :  { %v383_v34 = vmul.f32 %v3099_v6, %v331_v58  ;;  %v712_v3 = vrot.slane %v2023_v52, %v1813_v51  ;;  %v309_v14 = vadd.f32 %v307_v8, %v297_v22  ;;  %v3101_v49 = vstv %s3089_s17  ;;  %s2633_s17 = sld [smem:[#allocation2 + $0x2b]] }
  0xc1   :  { %v382_v18 = vmul.f32 %v3100_v24, %v332_v11  ;;  %v397_v38 = vmul.f32 %v3101_v49, %v381_v16  ;;  %v3102_v20 = vrot.slane %v1891_v25, %v1813_v51  ;;  %v392_v58 = vadd.f32 %v390_v61, %v302_v29 }
  0xc2   :  { %v398_v11 = vadd.f32 %v396_v13, %v308_v21  ;;  %v328_v2 = vsel %vm326_vm2, %v321_v57, %v323_v17  ;;  %v393_v8 = vadd.f32 %v391_v48, %v303_v45  ;;  %v3103_v7 = vstv %s1856_s26  ;;  %s2646_s26 = sld [smem:[#allocation2 + $0x10]] }
  0xc3   :  { %v384_v9 = vmul.f32 %v3102_v20, %v330_v32  ;;  %v403_v16 = vmul.f32 %v3103_v7, %v383_v34  ;;  %v3104_v6 = vstv %s1866_s8  ;;  %v329_v32 = vsel %vm326_vm2, %v319_v39, %v321_v57  ;;  %s2655_s8 = sld [smem:[#allocation2 + $0x34]] }
  0xc4   :  { %v409_v24 = vmul.f32 %v3104_v6, %v383_v34  ;;  %v3105_v49 = vmov %v3103_v7  ;;  %v3106_v13 = vmov %v3104_v6  ;;  %v327_v21 = vsel %vm326_vm2, %v323_v17, %v325_v30  ;;  %v1376_v30 = vld [vmem:[%s3111_s7 + $0x6] ss:$8 sm:$0xf] }
  0xc5   :  { %v402_v61 = vmul.f32 %v3105_v49, %v382_v18  ;;  %v408_v29 = vmul.f32 %v3106_v13, %v382_v18  ;;  %v3107_v45 = vrot.slane %v1891_v25, %v1826_v54  ;;  %v399_v34 = vadd.f32 %v397_v38, %v309_v14  ;;  %v439_v18 = vpop.permute.xlu1 %438  ;;  %v437_v13 = vpop.permute.xlu0 %436  ;;  %v1377_v14 = vld [vmem:[%s3111_s7 + $0x6] ss:$8 sm:$0xf0] }
  0xc6   :  { %v3108_v20 = vstv %s1882_s20  ;;  %v3109_v57 = vstv %s1905_s29  ;;  %v3110_v6 = vrot.slane %v1891_v25, %v1828_v55  ;;  %v716_v63 = vrot.slane %v2023_v52, %v1826_v54  ;;  %s3120_s20 = sld [smem:[#allocation15_spill]] }
  0xc7   :  { %v385_v48 = vmul.f32 %v3107_v45, %v329_v32  ;;  %v414_v39 = vmul.f32 %v3108_v20, %v384_v9  ;;  %v420_v7 = vmul.f32 %v3109_v57, %v384_v9  ;;  %v404_v38 = vadd.f32 %v402_v61, %v392_v58  ;;  %s3122_s29 = sld [smem:[#allocation16_spill]] }
  0xc8   :  { %v386_v49 = vmul.f32 %v3110_v6, %v328_v2  ;;  %v410_v17 = vadd.f32 %v408_v29, %v398_v11  ;;  %v3113_v32 = vmov %v3108_v20  ;;  %v3114_v45 = vmov %v3109_v57 }
  0xc9   :  { %v415_v9 = vmul.f32 %v3113_v32, %v385_v48  ;;  %v421_v20 = vmul.f32 %v3114_v45, %v385_v48  ;;  %v405_v57 = vadd.f32 %v403_v16, %v393_v8  ;;  %v411_v2 = vadd.f32 %v409_v24, %v399_v34  ;;  %v441_v48 = vpop.permute.xlu1 %440  ;;  %v451_v34 = vpop.permute.xlu0 %450 }
  0xca   :  { %v3115_v6 = vrot.slane %v1891_v25, %v1824_v53  ;;  %v459_v56 = vsel %vm452_vm3, %v437_v13, %v439_v18  ;;  %v720_v11 = vrot.slane %v2023_v52, %v1828_v55  ;;  %v2496_v61 = vor.u32 %v1377_v14, %v1376_v30 }
  0xcb   :  { %v417_v8 = vadd.f32 %v415_v9, %v405_v57  ;;  %v423_v16 = vadd.f32 %v421_v20, %v411_v2  ;;  %v3116_v24 = vstv %s3112_s0  ;;  %v3117_v29 = vstv %s1938_s22  ;;  %s3125_s22 = sld [smem:[#allocation17_spill]] }
  0xcc   :  { %v387_v22 = vmul.f32 %v3115_v6, %v327_v21  ;;  %v426_v25 = vmul.f32 %v3116_v24, %v386_v49  ;;  %v432_v21 = vmul.f32 %v3117_v29, %v386_v49  ;;  %v416_v32 = vadd.f32 %v414_v39, %v404_v38  ;;  %s2886_s0 = sld [smem:[#allocation2 + $0x35]] }
  0xcd   :  { %v422_v45 = vadd.f32 %v420_v7, %v410_v17  ;;  %v458_v6 = vsel %vm452_vm3, %v439_v18, %v441_v48  ;;  %v460_v58 = vsel %vm452_vm3, %v451_v34, %v437_v13  ;;  %v3118_v30 = vmov %v3116_v24 }
  0xce   :  { %v427_v14 = vmul.f32 %v3118_v30, %v387_v22  ;;  %v3119_v9 = vmov %v3117_v29  ;;  %v3121_v57 = vrot.slane %v1948_v10, %v1785_v42  ;;  %v3123_v39 = vrot.slane %v1948_v10, %v1783_v41  ;;  %v445_v29 = vpop.permute.xlu1 %444  ;;  %v443_v30 = vpop.permute.xlu0 %442 }
  0xcf   :  { %v433_v20 = vmul.f32 %v3119_v9, %v387_v22  ;;  %v3124_v18 = vrot.slane %v1948_v10, %v1787_v43  ;;  %v434_v2 = vadd.f32 %v432_v21, %v422_v45  ;;  %v3126_v9 = vstv %s3120_s20  ;;  %s2910_s20 = sld [smem:[#allocation2 + $0x1a]] }
  0xd0   :  { %v507_v49 = vmul.f32 %v3121_v57, %v459_v56  ;;  %v506_v7 = vmul.f32 %v3123_v39, %v460_v58  ;;  %v428_v56 = vadd.f32 %v426_v25, %v416_v32  ;;  %v429_v58 = vadd.f32 %v427_v14, %v417_v8 }
  0xd1   :  { %v508_v13 = vmul.f32 %v3124_v18, %v458_v6  ;;  %v435_v24 = vadd.f32 %v433_v20, %v423_v16  ;;  %v3127_v57 = vstv %s3122_s29  ;;  %v456_v18 = vsel %vm452_vm3, %v443_v30, %v445_v29  ;;  %s2922_s29 = sld [smem:[#allocation2 + $0x3e]] }
  0xd2   :  { %v516_v6 = vmul.f32 %v3126_v9, %v506_v7  ;;  %v522_v39 = vmul.f32 %v3127_v57, %v506_v7  ;;  %v457_v22 = vsel %vm452_vm3, %v441_v48, %v443_v30  ;;  %v3128_v25 = vmov %v3126_v9 }
  0xd3   :  { %v517_v21 = vmul.f32 %v3128_v25, %v507_v49  ;;  %v3129_v8 = vmov %v3127_v57  ;;  %v3130_v32 = vrot.slane %v1948_v10, %v1796_v46  ;;  %v3131_v14 = vrot.slane %v1948_v10, %v1813_v51 }
  0xd4   :  { %v523_v16 = vmul.f32 %v3129_v8, %v507_v49  ;;  %v3132_v9 = vstv %s3125_s22  ;;  %v534_v57 = vmul.f32 %v533_v35, %v508_v13  ;;  %v518_v17 = vadd.f32 %v516_v6, %v428_v56  ;;  %s2951_s22 = sld [smem:[#allocation2 + $0x47]] }
  0xd5   :  { %v509_v45 = vmul.f32 %v3130_v32, %v457_v22  ;;  %v510_v20 = vmul.f32 %v3131_v14, %v456_v18  ;;  %v528_v7 = vmul.f32 %v3132_v9, %v508_v13  ;;  %v524_v38 = vadd.f32 %v522_v39, %v434_v2  ;;  %v449_v32 = vpop.permute.xlu1 %448  ;;  %v447_v18 = vpop.permute.xlu0 %446 }
  0xd6   :  { %v3133_v48 = vmov %v3132_v9  ;;  %v3134_v25 = vstv %s2139_s5  ;;  %v453_v56 = vsel %vm452_vm3, %v449_v32, %v451_v34  ;;  %v454_v2 = vsel %vm452_vm3, %v447_v18, %v449_v32  ;;  %s2601_s5 = sld [smem:[#allocation2 + $0x45]] }
  0xd7   :  { %v529_v30 = vmul.f32 %v3133_v48, %v509_v45  ;;  %v535_v49 = vmul.f32 %v533_v35, %v509_v45  ;;  %v540_v8 = vmul.f32 %v3134_v25, %v510_v20  ;;  %v546_v22 = vmul.f32 %v545_v44, %v510_v20 }
  0xd8   :  { %v530_v14 = vadd.f32 %v528_v7, %v518_v17  ;;  %v536_v13 = vadd.f32 %v534_v57, %v524_v38  ;;  %v519_v35 = vadd.f32 %v517_v21, %v429_v58  ;;  %v525_v6 = vadd.f32 %v523_v16, %v435_v24 }
  0xd9   :  { %v3135_v39 = vrot.slane %v1948_v10, %v1824_v53  ;;  %v455_v38 = vsel %vm452_vm3, %v445_v29, %v447_v18  ;;  %v3136_v34 = vrot.slane %v1948_v10, %v1826_v54  ;;  %v3137_v58 = vrot.slane %v1948_v10, %v1828_v55  ;;  %v668_v29 = vpop.permute.xlu1 %667  ;;  %v666_v48 = vpop.permute.xlu0 %665 }
  0xda   :  { %v868_v21 = vstv %s2516_s25  ;;  %v874_v16 = vstv %s2525_s23  ;;  %v531_v20 = vadd.f32 %v529_v30, %v519_v35  ;;  %v537_v9 = vadd.f32 %v535_v49, %v525_v6  ;;  %s2944_s25 = sld [smem:[#allocation2 + $0x23]] }
  0xdb   :  { %v513_v45 = vmul.f32 %v3135_v39, %v453_v56  ;;  %v511_v17 = vmul.f32 %v3136_v34, %v455_v38  ;;  %v512_v24 = vmul.f32 %v3137_v58, %v454_v2  ;;  %v542_v7 = vadd.f32 %v540_v8, %v530_v14  ;;  %v1386_v39 = vld [vmem:[%s3111_s7 + $0x7] ss:$8 sm:$0xf] }
  0xdc   :  { %v548_v57 = vadd.f32 %v546_v22, %v536_v13  ;;  %v3138_v10 = vstv %s2223_s12  ;;  %v830_v22 = vrot.slane %v2496_v61, %v1787_v43  ;;  %v822_v14 = vrot.slane %v2496_v61, %v1783_v41 }
  0xdd   :  { %v541_v32 = vmul.f32 %v3134_v25, %v511_v17  ;;  %v547_v18 = vmul.f32 %v545_v44, %v511_v17  ;;  %v552_v56 = vmul.f32 %v551_v40, %v512_v24  ;;  %v558_v2 = vmul.f32 %v3138_v10, %v512_v24  ;;  %v2609_v38 = vpop.permute.xlu0 %663 }
  0xde   :  { %v553_v30 = vmul.f32 %v551_v40, %v513_v45  ;;  %v3139_v49 = vmov %v3138_v10  ;;  %v1387_v40 = vld [vmem:[%s3111_s7 + $0x7] ss:$8 sm:$0xf0]  ;;  %v880_v34 = vstv %s2549_s21  ;;  %v886_v17 = vstv %s2559_s13  ;;  %s3165_s13 = sld [smem:[#allocation19_spill]] }
  0xdf   :  { %v559_v8 = vmul.f32 %v3139_v49, %v513_v45  ;;  %v543_v44 = vadd.f32 %v541_v32, %v531_v20  ;;  %v549_v13 = vadd.f32 %v547_v18, %v537_v9  ;;  %v554_v35 = vadd.f32 %v552_v56, %v542_v7  ;;  %v670_v45 = vpop.permute.xlu1 %669 }
  0xe0   :  { %v560_v6 = vadd.f32 %v558_v2, %v548_v57  ;;  %v834_v58 = vrot.slane %v2496_v61, %v1796_v46  ;;  %v838_v24 = vrot.slane %v2496_v61, %v1813_v51  ;;  %v686_v25 = vsel %vm679_vm4, %v2609_v38, %v666_v48 }
  0xe1   :  { %v555_v20 = vadd.f32 %v553_v30, %v543_v44  ;;  %v561_v9 = vadd.f32 %v559_v8, %v549_v13  ;;  %v619_v7 = vadd.f32 %v2094_v31, %v554_v35  ;;  %v892_v32 = vstv %s2571_s30  ;;  %v672_v8 = vpop.permute.xlu0 %671 }
  0xe2   :  { %v625_v57 = vadd.f32 %v2105_v33, %v560_v6  ;;  %v850_v18 = vrot.slane %v2496_v61, %v1824_v53  ;;  %v2627_v56 = vor.u32 %v1387_v40, %v1386_v39  ;;  %v685_v33 = vsel %vm679_vm4, %v666_v48, %v668_v29 }
  0xe3   :  { %v620_v10 = vadd.f32 %v2083_v37, %v555_v20  ;;  %v626_v2 = vadd.f32 %v2085_v36, %v561_v9  ;;  %v631_v30 = vadd.f32 %v2092_v28, %v619_v7  ;;  %v674_v49 = vpop.permute.xlu1 %673  ;;  %v898_v44 = vstv %s2581_s1 }
  0xe4   :  { %v637_v31 = vadd.f32 %v2103_v27, %v625_v57  ;;  %v842_v13 = vrot.slane %v2496_v61, %v1826_v54  ;;  %v846_v36 = vrot.slane %v2496_v61, %v1828_v55  ;;  %v684_v48 = vsel %vm679_vm4, %v668_v29, %v670_v45 }
  0xe5   :  { %v632_v28 = vadd.f32 %v2132_v0, %v620_v10  ;;  %v638_v37 = vadd.f32 %v2141_v26, %v626_v2  ;;  %v643_v27 = vadd.f32 %v2336_v4, %v631_v30  ;;  %v3140_v6 = vrot.slane %v2023_v52, %v1783_v41  ;;  %v676_v57 = vpop.permute.xlu0 %675 }
  0xe6   :  { %v649_v35 = vadd.f32 %v2351_v23, %v637_v31  ;;  %v904_v40 = vstv %s2591_s10  ;;  %v910_v20 = vstv %s2601_s5  ;;  %v3141_v4 = vrot.slane %v2023_v52, %v1785_v42 }
  0xe7   :  { %v733_v39 = vmul.f32 %v3140_v6, %v686_v25  ;;  %v644_v0 = vadd.f32 %v2145_v1, %v632_v28  ;;  %v650_v26 = vadd.f32 %v2149_v47, %v638_v37  ;;  %v952_v29 = vrot.slane %v2627_v56, %v1785_v42  ;;  %v678_v47 = vpop.permute.xlu1 %677 }
  0xe8   :  { %v734_v23 = vmul.f32 %v3141_v4, %v685_v33  ;;  %v655_v9 = vadd.f32 %v2393_v15, %v643_v27  ;;  %v661_v7 = vadd.f32 %v2398_v60, %v649_v35  ;;  %v683_v1 = vsel %vm679_vm4, %v670_v45, %v672_v8 }
  0xe9   :  { %v994_v25 = vstv %s2617_s18  ;;  %v656_v10 = vadd.f32 %v2184_v5, %v644_v0  ;;  %v3142_v2 = vrot.slane %v2023_v52, %v1787_v43  ;;  %v956_v31 = vrot.slane %v2627_v56, %v1787_v43  ;;  %v792_v0 = vpop.permute.xlu0 %791 }
  0xea   :  { %v948_v15 = vrot.slane %v2627_v56, %v1783_v41  ;;  %v662_v60 = vadd.f32 %v2227_v19, %v650_v26  ;;  %v743_v45 = vmul.f32 %v742_v12, %v733_v39  ;;  %v3143_v33 = vstv %s2259_s15  ;;  %s2731_s15 = sld [smem:[#allocation2 + $0x22]] }
  0xeb   :  { %v735_v30 = vmul.f32 %v3142_v2, %v684_v48  ;;  %v749_v28 = vmul.f32 %v3143_v33, %v733_v39  ;;  %v682_v37 = vsel %vm679_vm4, %v672_v8, %v674_v49  ;;  %v744_v5 = vmul.f32 %v742_v12, %v734_v23  ;;  %v794_v12 = vpop.permute.xlu1 %793 }
  0xec   :  { %v736_v27 = vmul.f32 %v708_v59, %v683_v1  ;;  %v1000_v35 = vstv %s2633_s17  ;;  %v960_v19 = vrot.slane %v2627_v56, %v1796_v46  ;;  %v3144_v48 = vmov %v3143_v33 }
  0xed   :  { %v750_v6 = vmul.f32 %v3144_v48, %v734_v23  ;;  %v745_v8 = vadd.f32 %v743_v45, %v655_v9  ;;  %v751_v39 = vadd.f32 %v749_v28, %v661_v7  ;;  %v964_v59 = vrot.slane %v2627_v56, %v1813_v51 }
  0xee   :  { %v746_v26 = vadd.f32 %v744_v5, %v656_v10  ;;  %v737_v4 = vmul.f32 %v712_v3, %v682_v37  ;;  %v680_v1 = vsel %vm679_vm4, %v676_v57, %v678_v47  ;;  %v681_v23 = vsel %vm679_vm4, %v674_v49, %v676_v57 }
  0xef   :  { %v752_v2 = vadd.f32 %v750_v6, %v662_v60  ;;  %v755_v9 = vmul.f32 %v754_v62, %v735_v30  ;;  %v1006_v7 = vstv %s2646_s26  ;;  %v3145_v10 = vstv %s2346_s27  ;;  %v796_v5 = vpop.permute.xlu1 %795 }
  0xf0   :  { %v761_v33 = vmul.f32 %v3145_v10, %v735_v30  ;;  %v756_v28 = vmul.f32 %v754_v62, %v736_v27  ;;  %v687_v3 = vsel %vm679_vm4, %v678_v47, %v2609_v38  ;;  %v738_v49 = vmul.f32 %v716_v63, %v681_v23  ;;  %v2727_v62 = vpop.permute.xlu0 %789 }
  0xf1   :  { %v757_v57 = vadd.f32 %v755_v9, %v745_v8  ;;  %v3146_v60 = vmov %v3145_v10  ;;  %v739_v30 = vmul.f32 %v720_v11, %v680_v1  ;;  %v3147_v48 = vstv %s2386_s14 }
  0xf2   :  { %v762_v37 = vmul.f32 %v3146_v60, %v736_v27  ;;  %v758_v47 = vadd.f32 %v756_v28, %v746_v26  ;;  %v763_v63 = vadd.f32 %v761_v33, %v751_v39  ;;  %v767_v6 = vmul.f32 %v3147_v48, %v737_v4 }
  0xf3   :  { %v3148_v8 = vmov %v3147_v48  ;;  %v3149_v9 = vrot.slane %v2023_v52, %v1824_v53  ;;  %v3150_v1 = vstv %s2438_s11  ;;  %v811_v60 = vsel %vm805_vm5, %v792_v0, %v794_v12 }
  0xf4   :  { %v768_v27 = vmul.f32 %v3148_v8, %v738_v49  ;;  %v764_v23 = vadd.f32 %v762_v37, %v752_v2  ;;  %v774_v10 = vmul.f32 %v3150_v1, %v738_v49  ;;  %v3151_v38 = vmov %v3150_v1  ;;  %v800_v49 = vpop.permute.xlu1 %799 }
  0xf5   :  { %v740_v11 = vmul.f32 %v3149_v9, %v687_v3  ;;  %v773_v45 = vmul.f32 %v3151_v38, %v737_v4  ;;  %v812_v39 = vsel %vm805_vm5, %v2727_v62, %v792_v0  ;;  %v769_v33 = vadd.f32 %v767_v6, %v757_v57  ;;  %v798_v4 = vpop.permute.xlu0 %797  ;;  %v1397_v9 = vld [vmem:[%s3111_s7 + $0x40] ss:$8 sm:$0xf0] }
  0xf6   :  { %v3152_v52 = vstv %s2456_s4  ;;  %v859_v3 = vmul.f32 %v822_v14, %v812_v39  ;;  %v770_v38 = vadd.f32 %v768_v27, %v758_v47  ;;  %v3153_v57 = vstv %s2467_s19  ;;  %v1396_v14 = vld [vmem:[%s3111_s7 + $0x40] ss:$8 sm:$0xf]  ;;  %s2791_s4 = sld [smem:[#allocation2 + $0x8]] }
  0xf7   :  { %v779_v28 = vmul.f32 %v3152_v52, %v739_v30  ;;  %v775_v37 = vadd.f32 %v773_v45, %v763_v63  ;;  %v785_v48 = vmul.f32 %v3153_v57, %v739_v30  ;;  %v3154_v6 = vrot.slane %v2496_v61, %v1785_v42  ;;  %s2798_s7 = sld [smem:[#allocation2 + $0x2c]] }
  0xf8   :  { %v3155_v1 = vmov %v3152_v52  ;;  %v776_v47 = vadd.f32 %v774_v10, %v764_v23  ;;  %v810_v30 = vsel %vm805_vm5, %v794_v12, %v796_v5  ;;  %v869_v27 = vmul.f32 %v868_v21, %v859_v3  ;;  %v804_v23 = vpop.permute.xlu1 %803  ;;  %s2851_s19 = sld [smem:[#allocation2 + $0x11]] }
  0xf9   :  { %v860_v8 = vmul.f32 %v3154_v6, %v811_v60  ;;  %v780_v45 = vmul.f32 %v3155_v1, %v740_v11  ;;  %v875_v60 = vmul.f32 %v874_v16, %v859_v3  ;;  %v808_v39 = vsel %vm805_vm5, %v798_v4, %v800_v49  ;;  %v802_v10 = vpop.permute.xlu0 %801 }
  0xfa   :  { %v809_v52 = vsel %vm805_vm5, %v796_v5, %v798_v4  ;;  %v786_v6 = vmul.f32 %v3153_v57, %v740_v11  ;;  %v781_v1 = vadd.f32 %v779_v28, %v769_v33  ;;  %v1030_v26 = vstv %s2731_s15 }
  0xfb   :  { %v2789_v0 = vor.u32 %v1397_v9, %v1396_v14  ;;  %v787_v12 = vadd.f32 %v785_v48, %v775_v37  ;;  %v782_v3 = vadd.f32 %v780_v45, %v770_v38  ;;  %v870_v63 = vmul.f32 %v868_v21, %v860_v8 }
  0xfc   :  { %v861_v2 = vmul.f32 %v830_v22, %v810_v30  ;;  %v788_v5 = vadd.f32 %v786_v6, %v776_v47  ;;  %v876_v11 = vmul.f32 %v874_v16, %v860_v8  ;;  %v862_v33 = vmul.f32 %v834_v58, %v809_v52  ;;  %v920_v58 = vpop.permute.xlu1 %919 }
  0xfd   :  { %v863_v28 = vmul.f32 %v838_v24, %v808_v39  ;;  %v871_v21 = vadd.f32 %v869_v27, %v781_v1  ;;  %v877_v4 = vadd.f32 %v875_v60, %v787_v12  ;;  %v806_v22 = vsel %vm805_vm5, %v802_v10, %v804_v23  ;;  %v918_v38 = vpop.permute.xlu0 %917 }
  0xfe   :  { %v807_v37 = vsel %vm805_vm5, %v800_v49, %v802_v10  ;;  %v1036_v48 = vstv %s2757_s16  ;;  %v1078_v24 = vrot.slane %v2789_v0, %v1785_v42  ;;  %v1082_v8 = vrot.slane %v2789_v0, %v1787_v43 }
  0xff   :  { %v864_v16 = vmul.f32 %v842_v13, %v807_v37  ;;  %v872_v14 = vadd.f32 %v870_v63, %v782_v3  ;;  %v881_v49 = vmul.f32 %v880_v34, %v861_v2  ;;  %v887_v9 = vmul.f32 %v886_v17, %v861_v2 }
 0x100   :  { %v813_v13 = vsel %vm805_vm5, %v804_v23, %v2727_v62  ;;  %v878_v45 = vadd.f32 %v876_v11, %v788_v5  ;;  %v882_v47 = vmul.f32 %v880_v34, %v862_v33  ;;  %v888_v30 = vmul.f32 %v886_v17, %v862_v33 }
 0x101   :  { %v865_v27 = vmul.f32 %v846_v36, %v806_v22  ;;  %v883_v63 = vadd.f32 %v881_v49, %v871_v21  ;;  %v889_v60 = vadd.f32 %v887_v9, %v877_v4  ;;  %v893_v2 = vmul.f32 %v892_v32, %v863_v28  ;;  %v922_v36 = vpop.permute.xlu1 %921  ;;  %v916_v57 = vpop.permute.xlu0 %915 }
 0x102   :  { %v899_v39 = vmul.f32 %v898_v44, %v863_v28  ;;  %v866_v62 = vmul.f32 %v850_v18, %v813_v13  ;;  %v894_v34 = vmul.f32 %v892_v32, %v864_v16  ;;  %v900_v17 = vmul.f32 %v898_v44, %v864_v16 }
 0x103   :  { %v937_v52 = vsel %vm931_vm6, %v918_v38, %v920_v58  ;;  %v938_v6 = vsel %vm931_vm6, %v916_v57, %v918_v38  ;;  %v1120_v1 = vstv %s2791_s4  ;;  %v1126_v23 = vstv %s2798_s7 }
 0x104   :  { %v1074_v61 = vrot.slane %v2789_v0, %v1783_v41  ;;  %v884_v32 = vadd.f32 %v882_v47, %v872_v14  ;;  %v890_v18 = vadd.f32 %v888_v30, %v878_v45  ;;  %v905_v44 = vmul.f32 %v904_v40, %v865_v27 }
 0x105   :  { %v985_v10 = vmul.f32 %v948_v15, %v938_v6  ;;  %v895_v12 = vadd.f32 %v893_v2, %v883_v63  ;;  %v911_v3 = vmul.f32 %v910_v20, %v865_v27  ;;  %v986_v5 = vmul.f32 %v952_v29, %v937_v52  ;;  %v926_v4 = vpop.permute.xlu1 %925  ;;  %v924_v22 = vpop.permute.xlu0 %923 }
 0x106   :  { %v936_v11 = vsel %vm931_vm6, %v920_v58, %v922_v36  ;;  %v901_v33 = vadd.f32 %v899_v39, %v889_v60  ;;  %v906_v28 = vmul.f32 %v904_v40, %v866_v62  ;;  %v896_v21 = vadd.f32 %v894_v34, %v884_v32 }
 0x107   :  { %v902_v15 = vadd.f32 %v900_v17, %v890_v18  ;;  %v995_v37 = vmul.f32 %v994_v25, %v985_v10  ;;  %v1001_v16 = vmul.f32 %v1000_v35, %v985_v10  ;;  %v934_v29 = vsel %vm931_vm6, %v924_v22, %v926_v4 }
 0x108   :  { %v935_v58 = vsel %vm931_vm6, %v922_v36, %v924_v22  ;;  %v912_v38 = vmul.f32 %v910_v20, %v866_v62  ;;  %v907_v14 = vadd.f32 %v905_v44, %v895_v12  ;;  %v987_v40 = vmul.f32 %v956_v31, %v936_v11 }
 0x109   :  { %v988_v49 = vmul.f32 %v960_v19, %v935_v58  ;;  %v913_v9 = vadd.f32 %v911_v3, %v901_v33  ;;  %v996_v13 = vmul.f32 %v994_v25, %v986_v5  ;;  %v1002_v20 = vmul.f32 %v1000_v35, %v986_v5  ;;  %v930_v27 = vpop.permute.xlu1 %929  ;;  %v928_v63 = vpop.permute.xlu0 %927 }
 0x10a   :  { %v1086_v45 = vrot.slane %v2789_v0, %v1796_v46  ;;  %v908_v47 = vadd.f32 %v906_v28, %v896_v21  ;;  %v914_v31 = vadd.f32 %v912_v38, %v902_v15  ;;  %v997_v30 = vadd.f32 %v995_v37, %v907_v14 }
 0x10b   :  { %v989_v19 = vmul.f32 %v964_v59, %v934_v29  ;;  %v1003_v60 = vadd.f32 %v1001_v16, %v913_v9  ;;  %v932_v2 = vsel %vm931_vm6, %v928_v63, %v930_v27  ;;  %v1132_v25 = vstv %s2851_s19 }
 0x10c   :  { %v1090_v35 = vrot.slane %v2789_v0, %v1813_v51  ;;  %v1007_v39 = vmul.f32 %v1006_v7, %v987_v40  ;;  %v3156_v62 = vstv %s2655_s8  ;;  %v1008_v17 = vmul.f32 %v1006_v7, %v988_v49 }
 0x10d   :  { %v1013_v34 = vmul.f32 %v3156_v62, %v987_v40  ;;  %v933_v59 = vsel %vm931_vm6, %v926_v4, %v928_v63  ;;  %v3157_v52 = vmov %v3156_v62  ;;  %v939_v6 = vsel %vm931_vm6, %v930_v27, %v916_v57  ;;  %v1046_v33 = vpop.permute.xlu1 %1045  ;;  %v1044_v57 = vpop.permute.xlu0 %1043 }
 0x10e   :  { %v1014_v36 = vmul.f32 %v3157_v52, %v988_v49  ;;  %v3158_v32 = vrot.slane %v2627_v56, %v1826_v54  ;;  %v3159_v44 = vrot.slane %v2627_v56, %v1828_v55  ;;  %v998_v10 = vadd.f32 %v996_v13, %v908_v47 }
 0x10f   :  { %v1004_v12 = vadd.f32 %v1002_v20, %v914_v31  ;;  %v1009_v3 = vadd.f32 %v1007_v39, %v997_v30  ;;  %v3160_v5 = vstv %s2693_s2  ;;  %v1015_v28 = vadd.f32 %v1013_v34, %v1003_v60 }
 0x110   :  { %v990_v18 = vmul.f32 %v3158_v32, %v933_v59  ;;  %v991_v7 = vmul.f32 %v3159_v44, %v932_v2  ;;  %v1019_v11 = vmul.f32 %v3160_v5, %v989_v19  ;;  %v3161_v21 = vstv %s2710_s28 }
 0x111   :  { %v1025_v15 = vmul.f32 %v3161_v21, %v989_v19  ;;  %v3162_v4 = vmov %v3160_v5  ;;  %v3163_v37 = vmov %v3161_v21  ;;  %v1010_v29 = vadd.f32 %v1008_v17, %v998_v10  ;;  %v1048_v30 = vpop.permute.xlu1 %1047  ;;  %v1042_v19 = vpop.permute.xlu0 %1041 }
 0x112   :  { %v1020_v22 = vmul.f32 %v3162_v4, %v990_v18  ;;  %v1026_v16 = vmul.f32 %v3163_v37, %v990_v18  ;;  %v3164_v58 = vrot.slane %v2627_v56, %v1824_v53  ;;  %v1063_v14 = vsel %vm1057_vm7, %v1044_v57, %v1046_v33 }
 0x113   :  { %v1138_v40 = vstv %s2886_s0  ;;  %v1016_v49 = vadd.f32 %v1014_v36, %v1004_v12  ;;  %v1031_v9 = vmul.f32 %v1030_v26, %v991_v7  ;;  %v1037_v13 = vmul.f32 %v1036_v48, %v991_v7 }
 0x114   :  { %v992_v38 = vmul.f32 %v3164_v58, %v939_v6  ;;  %v1102_v20 = vrot.slane %v2789_v0, %v1824_v53  ;;  %v1021_v47 = vadd.f32 %v1019_v11, %v1009_v3  ;;  %v1022_v56 = vadd.f32 %v1020_v22, %v1010_v29 }
 0x115   :  { %v1112_v31 = vmul.f32 %v1078_v24, %v1063_v14  ;;  %v1094_v27 = vrot.slane %v2789_v0, %v1826_v54  ;;  %v1027_v53 = vadd.f32 %v1025_v15, %v1015_v28  ;;  %v1028_v63 = vadd.f32 %v1026_v16, %v1016_v49  ;;  %v1052_v6 = vpop.permute.xlu1 %1051 }
 0x116   :  { %v1062_v60 = vsel %vm1057_vm7, %v1046_v33, %v1048_v30  ;;  %v1064_v42 = vsel %vm1057_vm7, %v1042_v19, %v1044_v57  ;;  %v1032_v24 = vmul.f32 %v1030_v26, %v992_v38  ;;  %v1144_v39 = vstv %s2910_s20 }
 0x117   :  { %v1113_v2 = vmul.f32 %v1082_v8, %v1062_v60  ;;  %v1111_v54 = vmul.f32 %v1074_v61, %v1064_v42  ;;  %v1038_v62 = vmul.f32 %v1036_v48, %v992_v38  ;;  %v1033_v34 = vadd.f32 %v1031_v9, %v1021_v47  ;;  %v1050_v48 = vpop.permute.xlu0 %1049 }
 0x118   :  { %v1039_v17 = vadd.f32 %v1037_v13, %v1027_v53  ;;  %v1150_v59 = vstv %s2922_s29  ;;  %v1122_v52 = vmul.f32 %v1120_v1, %v1112_v31  ;;  %v1034_v43 = vadd.f32 %v1032_v24, %v1022_v56 }
 0x119   :  { %v1121_v36 = vmul.f32 %v1120_v1, %v1111_v54  ;;  %v1127_v26 = vmul.f32 %v1126_v23, %v1111_v54  ;;  %v1128_v8 = vmul.f32 %v1126_v23, %v1112_v31  ;;  %v1133_v41 = vmul.f32 %v1132_v25, %v1113_v2  ;;  %v1056_v5 = vpop.permute.xlu1 %1055 }
 0x11a   :  { %v1139_v61 = vmul.f32 %v1138_v40, %v1113_v2  ;;  %v1040_v32 = vadd.f32 %v1038_v62, %v1028_v63  ;;  %v1060_v7 = vsel %vm1057_vm7, %v1050_v48, %v1052_v6  ;;  %v1061_v1 = vsel %vm1057_vm7, %v1048_v30, %v1050_v48 }
 0x11b   :  { %v1123_v18 = vadd.f32 %v1121_v36, %v1033_v34  ;;  %v1129_v44 = vadd.f32 %v1127_v26, %v1039_v17  ;;  %v1114_v10 = vmul.f32 %v1086_v45, %v1061_v1  ;;  %v1115_v23 = vmul.f32 %v1090_v35, %v1060_v7  ;;  %v1054_v46 = vpop.permute.xlu0 %1053 }
 0x11c   :  { %v1098_v12 = vrot.slane %v2789_v0, %v1828_v55  ;;  %v1156_v3 = vstv %s2944_s25  ;;  %v1124_v11 = vadd.f32 %v1122_v52, %v1034_v43  ;;  %v1162_v33 = vstv %s2951_s22 }
 0x11d   :  { %v1135_v57 = vadd.f32 %v1133_v41, %v1123_v18  ;;  %v1141_v28 = vadd.f32 %v1139_v61, %v1129_v44  ;;  %v1134_v21 = vmul.f32 %v1132_v25, %v1114_v10  ;;  %v1140_v15 = vmul.f32 %v1138_v40, %v1114_v10 }
 0x11e   :  { %v1145_v4 = vmul.f32 %v1144_v39, %v1115_v23  ;;  %v1151_v22 = vmul.f32 %v1150_v59, %v1115_v23  ;;  %v1065_v45 = vsel %vm1057_vm7, %v1056_v5, %v1042_v19  ;;  %v1058_v51 = vsel %vm1057_vm7, %v1054_v46, %v1056_v5 }
 0x11f   :  { %v1059_v55 = vsel %vm1057_vm7, %v1052_v6, %v1054_v46  ;;  %v1130_v0 = vadd.f32 %v1128_v8, %v1040_v32  ;;  %v1118_v35 = vmul.f32 %v1102_v20, %v1065_v45  ;;  %v1117_v16 = vmul.f32 %v1098_v12, %v1058_v51 }
 0x120   :  { %v1116_v37 = vmul.f32 %v1094_v27, %v1059_v55  ;;  %v1136_v29 = vadd.f32 %v1134_v21, %v1124_v11  ;;  %v1147_v25 = vadd.f32 %v1145_v4, %v1135_v57  ;;  %v1153_v38 = vadd.f32 %v1151_v22, %v1141_v28 }
 0x121   :  { %v1142_v58 = vadd.f32 %v1140_v15, %v1130_v0  ;;  %v1157_v40 = vmul.f32 %v1156_v3, %v1117_v16  ;;  %v1158_v9 = vmul.f32 %v1156_v3, %v1118_v35  ;;  %v1163_v13 = vmul.f32 %v1162_v33, %v1117_v16 }
 0x122   :  { %v1146_v14 = vmul.f32 %v1144_v39, %v1116_v37  ;;  %v1152_v49 = vmul.f32 %v1150_v59, %v1116_v37  ;;  %v1164_v31 = vmul.f32 %v1162_v33, %v1118_v35 }
 0x123   :  { %v1159_v30 = vadd.f32 %v1157_v40, %v1147_v25  ;;  %v1165_v19 = vadd.f32 %v1163_v13, %v1153_v38 }
 0x124   :  { %v1148_v47 = vadd.f32 %v1146_v14, %v1136_v29  ;;  %v1154_v56 = vadd.f32 %v1152_v49, %v1142_v58 }
 0x126   :  { %v1160_v50 = vadd.f32 %v1158_v9, %v1148_v47  ;;  %v1166_v53 = vadd.f32 %v1164_v31, %v1154_v56 }
 0x128   :  { %1295 = vmatprep.mubr.f32.mxu0 %v1160_v50  ;;  %1301 = vmatprep.mubr.f32.mxu1 %v1166_v53 }
 0x129   :  { %1296 = vmatmul.mubr.f32.vlgmr.msra.gmra.mxu0 %v1159_v30  ;;  %1302 = vmatmul.mubr.f32.vlgmr.msra.gmra.mxu1 %v1165_v19 }
 0x1e9   :  { %v1297_v20 = vpop.f32.mrf.mxu0  ;;  %v1303_v27 = vpop.f32.mrf.mxu1 }
 0x1ea   :  { %1308 = vst [vmem:[%s3165_s13] sm:$0xff] %v1297_v20  ;;  %1310 = vst [vmem:[%s3165_s13 + $0x10] sm:$0xff] %v1303_v27 }
 0x1eb   :  { %v1299_v63 = vpop.f32.mrf.mxu0  ;;  %v1305_v60 = vpop.f32.mrf.mxu1 }
 0x1ec   :  { %1309 = vst [vmem:[%s3165_s13 + $0x8] sm:$0xff] %v1299_v63  ;;  %1311 = vst [vmem:[%s3165_s13 + $0x18] sm:$0xff] %v1305_v60 }
 0x1ed   :  { %1316 = vsyncpa [#allocation3], 1 }
 0x1ee   :  { %1317 = vsyncpa [#allocation5], 1 }

</bundles_post_ra>
